<compile_context>
chip_gen: v7x
topology: tpu7x:2x2x1
jax: 0.10.0
libtpu: 0.0.40
codegen_flags: <defaults>
</compile_context>

<pallas_src>
import jax
import jax.numpy as jnp
from jax.experimental import pallas as pl
from jax.experimental.pallas import tpu as pltpu

# ------------------------- configuration (stride == 1) -------------------------
N, C, H, W = 8, 16, 16, 16      # in_channels == out_channels (needed for residual)
GROUPS = 8
FACTOR = 1.0
KSIZE = 3
PAD = 1
EPS = 1e-5
CMID = int(C * FACTOR)          # dw conv output channels
MARGIN = 8                      # top/bottom row margin (keeps store offsets 8-aligned)
IMAGES_PER_STEP = 4             # whole images per grid step (halo-free M split)
ROWS_PER_STEP = IMAGES_PER_STEP * H
assert H & (H - 1) == 0, "in-kernel row mask uses `& (H-1)` (H must be a power of 2)"
assert (N * H) % ROWS_PER_STEP == 0 and ROWS_PER_STEP % 8 == 0
# TODO(synk): stride != 1 branch (AvgPool2d(2) + 1x1 conv + BN downsample) not
# implemented; this script exercises the stride == 1 configuration only.
# TODO(synk): optional generation-specific variants (bf16 staging scratch on
# v6e/v7x, fp8 weight operands on v7x) are not enabled to keep one portable
# f32/bf16 path that is also correct on v5e.


# --------------------------------- kernel --------------------------------------
def _grouped_conv3x3_rows(src_ref, m_up, m_dn, bands_ref, bias_ref, nh):
    """3x3 grouped conv (+folded-BN bias) in row-packed layout.

    src_ref  : (nh + 2*MARGIN, W*Cin) f32 scratch; image rows at [MARGIN, MARGIN+nh)
    m_up/m_dn: (nh, 1) bool validity of the dh = -1 / dh = +1 vertical taps
    bands_ref: (3, W*Cin, W*Cout) bf16 banded (block-Toeplitz) per-tap weights
    bias_ref : (1, W*Cout) f32
    returns  : (nh, W*Cout) f32
    """
    # dh = 0 tap (never masked) initializes the accumulator directly.
    mid = src_ref[pl.ds(MARGIN, nh), :]
    acc = jnp.dot(mid.astype(jnp.bfloat16), bands_ref[1],
                  preferred_element_type=jnp.float32)
    # dh = -1 tap: rows at an image's top edge are zeroed via a NaN-safe
    # select, so uninitialized scratch margin rows can never leak through.
    up = jnp.where(m_up, src_ref[pl.ds(MARGIN - 1, nh), :], 0.0)
    acc = acc + jnp.dot(up.astype(jnp.bfloat16), bands_ref[0],
                        preferred_element_type=jnp.float32)
    # dh = +1 tap: rows at an image's bottom edge are zeroed.
    dn = jnp.where(m_dn, src_ref[pl.ds(MARGIN + 1, nh), :], 0.0)
    acc = acc + jnp.dot(dn.astype(jnp.bfloat16), bands_ref[2],
                        preferred_element_type=jnp.float32)
    return acc + bias_ref[...]


def vargconv_block_kernel(xres_ref,
                          B1_ref, b1_ref, P1_ref, bp1_ref,
                          B2_ref, b2_ref, P2_ref, bp2_ref,
                          out_ref, xs_ref, y2s_ref):
    nh = out_ref.shape[0]

    # Stage the activation block into the margin-carrying scratch: one aligned
    # (offset = MARGIN = 8) full-256-lane store; no separate padded input DMA.
    x = xres_ref[...]
    xs_ref[pl.ds(MARGIN, nh), :] = x

    # Vertical-neighbour validity masks, built in-kernel. Rows are packed as
    # (image, row-in-image) and each grid step owns whole images, so
    # `row & (H-1)` is the row index within its image.
    ih = jax.lax.broadcasted_iota(jnp.int32, (nh, 1), 0) & (H - 1)
    m_up = ih >= 1          # dh = -1 needs row i-1 inside the same image
    m_dn = ih <= H - 2      # dh = +1 needs row i+1 inside the same image

    # ---- body[0]: grouped 3x3 conv (+BN folded) + ReLU ----
    h1 = jnp.maximum(
        _grouped_conv3x3_rows(xs_ref, m_up, m_dn, B1_ref, b1_ref, nh), 0.0)
    # ---- body[0]: pointwise 1x1 conv (+BN folded), no activation ----
    y2 = jnp.dot(h1.astype(jnp.bfloat16), P1_ref[...],
                 preferred_element_type=jnp.float32) + bp1_ref[...]

    # Stage y2 for the second 3x3 conv (aligned, unmasked full-lane store).
    y2s_ref[pl.ds(MARGIN, nh), :] = y2

    # ---- body[1]: grouped 3x3 conv (+BN folded) + ReLU ----
    h2 = jnp.maximum(
        _grouped_conv3x3_rows(y2s_ref, m_up, m_dn, B2_ref, b2_ref, nh), 0.0)
    # ---- body[1]: pointwise 1x1 conv (+BN folded) ----
    y4 = jnp.dot(h2.astype(jnp.bfloat16), P2_ref[...],
                 preferred_element_type=jnp.float32) + bp2_ref[...]

    # ---- shortcut add (stride == 1 -> shortcut = x), lane-dense store ----
    out_ref[...] = y4 + x


# --------------------------------- wrapper --------------------------------------
def vargconv_block(x_nhwc, kparams, rows_per_step=ROWS_PER_STEP):
    (B1, b1r, P1, bp1r, B2, b2r, P2, bp2r) = kparams
    n, h, w, c = x_nhwc.shape
    nh, wl = n * h, w * c
    assert nh % rows_per_step == 0 and rows_per_step % h == 0

    xres = x_nhwc.reshape(nh, wl)                     # lane-dense (rows, W*C)
    grid = (nh // rows_per_step,)

    out_rows = pl.pallas_call(
        vargconv_block_kernel,
        out_shape=jax.ShapeDtypeStruct((nh, wl), jnp.float32),
        grid_spec=pltpu.PrefetchScalarGridSpec(
            num_scalar_prefetch=0,
            grid=grid,                                # M split over whole images
            in_specs=[
                pl.BlockSpec((rows_per_step, wl), lambda i: (i, 0)),
                # Weights / biases: constant block index -> stay resident in
                # VMEM across all grid steps (fetched once per core).
                pl.BlockSpec(B1.shape,   lambda i: (0, 0, 0)),
                pl.BlockSpec(b1r.shape,  lambda i: (0, 0)),
                pl.BlockSpec(P1.shape,   lambda i: (0, 0)),
                pl.BlockSpec(bp1r.shape, lambda i: (0, 0)),
                pl.BlockSpec(B2.shape,   lambda i: (0, 0, 0)),
                pl.BlockSpec(b2r.shape,  lambda i: (0, 0)),
                pl.BlockSpec(P2.shape,   lambda i: (0, 0)),
                pl.BlockSpec(bp2r.shape, lambda i: (0, 0)),
            ],
            out_specs=pl.BlockSpec((rows_per_step, wl), lambda i: (i, 0)),
            scratch_shapes=[
                pltpu.VMEM((rows_per_step + 2 * MARGIN, wl), jnp.float32),  # x staging
                pltpu.VMEM((rows_per_step + 2 * MARGIN, wl), jnp.float32),  # y2 staging
            ],
        ),
        # Each step owns whole images (halo-free) -> safe to parallelize; on
        # v7x this engages the second TensorCore, elsewhere it is a no-op.
        compiler_params=pltpu.CompilerParams(dimension_semantics=("parallel",)),
    )(xres, B1, b1r, P1, bp1r, B2, b2r, P2, bp2r)

    return out_rows.reshape(n, h, w, c)


# --------------------- parameter construction / BN folding ----------------------
def grouped_to_dense(wt, groups):
    """(Cout, Cin/groups, KH, KW) grouped-conv weight -> dense (KH, KW, Cin, Cout)."""
    cout, cin_g, kh, kw = wt.shape
    cin = cin_g * groups
    cout_g = cout // groups
    dense = jnp.zeros((kh, kw, cin, cout), jnp.float32)
    for g in range(groups):
        co = slice(g * cout_g, (g + 1) * cout_g)
        ci = slice(g * cin_g, (g + 1) * cin_g)
        dense = dense.at[:, :, ci, co].set(jnp.transpose(wt[co], (2, 3, 1, 0)))
    return dense


def fold_bn(w_dense, b, gamma, beta, mean, var):
    """Fold eval-mode BatchNorm into conv weight (last axis = out channel) + bias."""
    s = gamma / jnp.sqrt(var + EPS)
    return w_dense * s, (b - mean) * s + beta


def banded_dw_weights(w_taps):
    """(3, 3, Cin, Cout) per-tap dense dw weights -> (3, W*Cin, W*Cout) banded
    (block-Toeplitz) matrices, one per vertical tap kh; the 3 horizontal taps
    and the horizontal zero-padding are folded into the band structure."""
    _, _, cin, cout = w_taps.shape
    mats = []
    for kh in range(3):
        m = jnp.zeros((W * cin, W * cout), jnp.float32)
        for kw in range(3):
            sel = jnp.eye(W, W, k=1 - kw, dtype=jnp.float32)  # source col j2 = j + kw - 1
            m = m + jnp.kron(sel, w_taps[kh, kw])
        mats.append(m)
    return jnp.stack(mats, axis=0)


def make_params(key):
    ks = list(jax.random.split(key, 24))
    p = {}

    def conv_w(k, shape):
        return jax.random.normal(k, shape, jnp.float32) * 0.1

    def bn_p(k, ch):
        k1, k2, k3, k4 = jax.random.split(k, 4)
        gamma = jax.random.uniform(k1, (ch,), jnp.float32, 0.5, 1.5)
        beta = jax.random.normal(k2, (ch,), jnp.float32) * 0.1
        mean = jax.random.normal(k3, (ch,), jnp.float32) * 0.1
        var = jax.random.uniform(k4, (ch,), jnp.float32, 0.5, 1.5)
        return gamma, beta, mean, var

    # body[0]: dw grouped 3x3 (C -> CMID), pw 1x1 (CMID -> C)
    p["dw1_w"] = conv_w(ks[0], (CMID, C // GROUPS, KSIZE, KSIZE))
    p["dw1_b"] = jax.random.normal(ks[1], (CMID,), jnp.float32) * 0.1
    p["bn_dw1"] = bn_p(ks[2], CMID)
    p["pw1_w"] = conv_w(ks[3], (C, CMID, 1, 1))
    p["pw1_b"] = jax.random.normal(ks[4], (C,), jnp.float32) * 0.1
    p["bn_pw1"] = bn_p(ks[5], C)
    # body[1]: dw grouped 3x3 (C -> CMID), pw 1x1 (CMID -> C)
    p["dw2_w"] = conv_w(ks[6], (CMID, C // GROUPS, KSIZE, KSIZE))
    p["dw2_b"] = jax.random.normal(ks[7], (CMID,), jnp.float32) * 0.1
    p["bn_dw2"] = bn_p(ks[8], CMID)
    p["pw2_w"] = conv_w(ks[9], (C, CMID, 1, 1))
    p["pw2_b"] = jax.random.normal(ks[10], (C,), jnp.float32) * 0.1
    p["bn_pw2"] = bn_p(ks[11], C)
    return p


def fold_params_for_kernel(p):
    w1, b1 = fold_bn(grouped_to_dense(p["dw1_w"], GROUPS), p["dw1_b"], *p["bn_dw1"])
    wp1, bp1 = fold_bn(jnp.transpose(p["pw1_w"][:, :, 0, 0]), p["pw1_b"], *p["bn_pw1"])
    w2, b2 = fold_bn(grouped_to_dense(p["dw2_w"], GROUPS), p["dw2_b"], *p["bn_dw2"])
    wp2, bp2 = fold_bn(jnp.transpose(p["pw2_w"][:, :, 0, 0]), p["pw2_b"], *p["bn_pw2"])

    # TODO(synk): the banded / kron(I_W, .) expansion assumes W*C fits in one
    # MXU tile (256 here); at much larger channel counts switch to a per-group
    # or pixel-im2col formulation to avoid a dense-weight FLOP blowup.
    eye_w = jnp.eye(W, dtype=jnp.float32)
    B1 = banded_dw_weights(w1).astype(jnp.bfloat16)
    P1 = jnp.kron(eye_w, wp1).astype(jnp.bfloat16)
    B2 = banded_dw_weights(w2).astype(jnp.bfloat16)
    P2 = jnp.kron(eye_w, wp2).astype(jnp.bfloat16)

    def rowbias(b):  # per-channel bias -> lane-dense (1, W*C) row bias
        return jnp.tile(b, (W,))[None, :].astype(jnp.float32)

    return (B1, rowbias(b1), P1, rowbias(bp1),
            B2, rowbias(b2), P2, rowbias(bp2))


# ------------------------------ pure-JAX reference ------------------------------
def ref_forward_nchw(x, p):
    def conv2d(x, w, b, groups, padding):
        y = jax.lax.conv_general_dilated(
            x, w, window_strides=(1, 1),
            padding=((padding, padding), (padding, padding)),
            dimension_numbers=("NCHW", "OIHW", "NCHW"),
            feature_group_count=groups)
        return y + b[None, :, None, None]

    def bn(x, gamma, beta, mean, var):
        s = gamma / jnp.sqrt(var + EPS)
        return (x - mean[None, :, None, None]) * s[None, :, None, None] \
            + beta[None, :, None, None]

    h = conv2d(x, p["dw1_w"], p["dw1_b"], GROUPS, PAD)
    h = jax.nn.relu(bn(h, *p["bn_dw1"]))
    h = conv2d(h, p["pw1_w"], p["pw1_b"], 1, 0)
    h = bn(h, *p["bn_pw1"])
    h = conv2d(h, p["dw2_w"], p["dw2_b"], GROUPS, PAD)
    h = jax.nn.relu(bn(h, *p["bn_dw2"]))
    h = conv2d(h, p["pw2_w"], p["pw2_b"], 1, 0)
    h = bn(h, *p["bn_pw2"])
    return h + x


# ----------------------------------- main ---------------------------------------
if __name__ == "__main__":
    key = jax.random.PRNGKey(0)
    kx, kp = jax.random.split(key)

    # PyTorch-convention input: NCHW
    x_nchw = jax.random.normal(kx, (N, C, H, W), jnp.float32)

    params = make_params(kp)
    kparams = fold_params_for_kernel(params)

    # NCHW -> NHWC (channels on the lane axis) for the kernel, back afterwards
    x_nhwc = jnp.transpose(x_nchw, (0, 2, 3, 1))
    out_nhwc = vargconv_block(x_nhwc, kparams)
    out_nhwc = jax.block_until_ready(out_nhwc)
    out_nchw = jnp.transpose(out_nhwc, (0, 3, 1, 2))

    ref = ref_forward_nchw(x_nchw, params)
    assert out_nchw.shape == ref.shape, (out_nchw.shape, ref.shape)
    # MXU operands are bf16 (f32 accumulation), so compare against the f32
    # reference with a bf16-level tolerance.
    assert bool(jnp.allclose(out_nchw, ref, atol=2e-2, rtol=2e-2)), \
        f"max abs err = {float(jnp.max(jnp.abs(out_nchw - ref)))}"

    print("KERNEL_OK")
</pallas_src>

<mosaic_0001>
module attributes {stable_mosaic.version = 11 : i64} {
  func.func @vargconv_block_kernel(%arg0: i32, %arg1: memref<64x256xf32, #tpu.memory_space<vmem>>, %arg2: memref<3x256x256xbf16, #tpu.memory_space<vmem>>, %arg3: memref<1x256xf32, #tpu.memory_space<vmem>>, %arg4: memref<256x256xbf16, #tpu.memory_space<vmem>>, %arg5: memref<1x256xf32, #tpu.memory_space<vmem>>, %arg6: memref<3x256x256xbf16, #tpu.memory_space<vmem>>, %arg7: memref<1x256xf32, #tpu.memory_space<vmem>>, %arg8: memref<256x256xbf16, #tpu.memory_space<vmem>>, %arg9: memref<1x256xf32, #tpu.memory_space<vmem>>, %arg10: memref<64x256xf32, #tpu.memory_space<vmem>>, %arg11: memref<80x256xf32, #tpu.memory_space<vmem>>, %arg12: memref<80x256xf32, #tpu.memory_space<vmem>>) attributes {dimension_semantics = [#tpu.dimension_semantics<parallel>], iteration_bounds = array<i64: 2>, scalar_prefetch = 0 : i64, scratch_operands = 2 : i64, tpu.core_type = #tpu.core_type<tc>, window_params = [{transform_indices = @transform_0, window_bounds = array<i64: 64, 256>}, {pipeline_mode = #tpu.pipeline_mode<synchronous>, transform_indices = @transform_1, window_bounds = array<i64: 3, 256, 256>}, {pipeline_mode = #tpu.pipeline_mode<synchronous>, transform_indices = @transform_2, window_bounds = array<i64: 1, 256>}, {pipeline_mode = #tpu.pipeline_mode<synchronous>, transform_indices = @transform_3, window_bounds = array<i64: 256, 256>}, {pipeline_mode = #tpu.pipeline_mode<synchronous>, transform_indices = @transform_4, window_bounds = array<i64: 1, 256>}, {pipeline_mode = #tpu.pipeline_mode<synchronous>, transform_indices = @transform_5, window_bounds = array<i64: 3, 256, 256>}, {pipeline_mode = #tpu.pipeline_mode<synchronous>, transform_indices = @transform_6, window_bounds = array<i64: 1, 256>}, {pipeline_mode = #tpu.pipeline_mode<synchronous>, transform_indices = @transform_7, window_bounds = array<i64: 256, 256>}, {pipeline_mode = #tpu.pipeline_mode<synchronous>, transform_indices = @transform_8, window_bounds = array<i64: 1, 256>}, {transform_indices = @transform_9, window_bounds = array<i64: 64, 256>}]} {
    %c0 = arith.constant 0 : index
    %c0_0 = arith.constant 0 : index
    %0 = vector.load %arg1[%c0, %c0_0] : memref<64x256xf32, #tpu.memory_space<vmem>>, vector<64x256xf32>
    %c8 = arith.constant 8 : index
    %c0_1 = arith.constant 0 : index
    %1 = vector.load %arg11[%c8, %c0_1] : memref<80x256xf32, #tpu.memory_space<vmem>>, vector<64x256xf32>
    tpu.vector_store %arg11[%c8, %c0_1], %0 {strides = array<i32>} : memref<80x256xf32, #tpu.memory_space<vmem>>, vector<64x256xf32>,
    %2 = tpu.iota {dimensions = array<i32: 0>} : vector<64x1xi32>
    %c15_i32 = arith.constant 15 : i32
    %3 = vector.broadcast %c15_i32 : i32 to vector<64x1xi32>
    %4 = arith.andi %2, %3 : vector<64x1xi32>
    %c1_i32 = arith.constant 1 : i32
    %5 = vector.broadcast %c1_i32 : i32 to vector<64x1xi32>
    %6 = arith.cmpi sge, %4, %5 : vector<64x1xi32>
    %c14_i32 = arith.constant 14 : i32
    %7 = vector.broadcast %c14_i32 : i32 to vector<64x1xi32>
    %8 = arith.cmpi sle, %4, %7 : vector<64x1xi32>
    %c8_2 = arith.constant 8 : index
    %c0_3 = arith.constant 0 : index
    %9 = vector.load %arg11[%c8_2, %c0_3] : memref<80x256xf32, #tpu.memory_space<vmem>>, vector<64x256xf32>
    %10 = arith.truncf %9 : vector<64x256xf32> to vector<64x256xbf16>
    %c1 = arith.constant 1 : index
    %c0_4 = arith.constant 0 : index
    %c0_5 = arith.constant 0 : index
    %11 = vector.load %arg2[%c1, %c0_4, %c0_5] : memref<3x256x256xbf16, #tpu.memory_space<vmem>>, vector<1x256x256xbf16>
    %12 = vector.shape_cast %11 : vector<1x256x256xbf16> to vector<256x256xbf16>
    %cst = arith.constant dense<0.000000e+00> : vector<64x256xf32>
    %13 = tpu.matmul %10, %12, %cst {dimension_numbers = #tpu.dot_dimension_numbers<[1], [0], [0], [1], [0, 0, 1, 1], [], []>} : vector<64x256xbf16>, vector<256x256xbf16>, vector<64x256xf32> -> vector<64x256xf32>
    %c7 = arith.constant 7 : index
    %c0_6 = arith.constant 0 : index
    %14 = vector.load %arg11[%c7, %c0_6] : memref<80x256xf32, #tpu.memory_space<vmem>>, vector<64x256xf32>
    %cst_7 = arith.constant 0.000000e+00 : f32
    %15 = vector.shape_cast %6 : vector<64x1xi1> to vector<64x1xi1>
    %16 = vector.broadcast %15 : vector<64x1xi1> to vector<64x256xi1>
    %17 = vector.broadcast %cst_7 : f32 to vector<64x256xf32>
    %18 = arith.select %16, %14, %17 : vector<64x256xi1>, vector<64x256xf32>
    %19 = arith.truncf %18 : vector<64x256xf32> to vector<64x256xbf16>
    %c0_8 = arith.constant 0 : index
    %c0_9 = arith.constant 0 : index
    %c0_10 = arith.constant 0 : index
    %20 = vector.load %arg2[%c0_8, %c0_9, %c0_10] : memref<3x256x256xbf16, #tpu.memory_space<vmem>>, vector<1x256x256xbf16>
    %21 = vector.shape_cast %20 : vector<1x256x256xbf16> to vector<256x256xbf16>
    %cst_11 = arith.constant dense<0.000000e+00> : vector<64x256xf32>
    %22 = tpu.matmul %19, %21, %cst_11 {dimension_numbers = #tpu.dot_dimension_numbers<[1], [0], [0], [1], [0, 0, 1, 1], [], []>} : vector<64x256xbf16>, vector<256x256xbf16>, vector<64x256xf32> -> vector<64x256xf32>
    %23 = arith.addf %13, %22 : vector<64x256xf32>
    %c9 = arith.constant 9 : index
    %c0_12 = arith.constant 0 : index
    %24 = vector.load %arg11[%c9, %c0_12] : memref<80x256xf32, #tpu.memory_space<vmem>>, vector<64x256xf32>
    %cst_13 = arith.constant 0.000000e+00 : f32
    %25 = vector.shape_cast %8 : vector<64x1xi1> to vector<64x1xi1>
    %26 = vector.broadcast %25 : vector<64x1xi1> to vector<64x256xi1>
    %27 = vector.broadcast %cst_13 : f32 to vector<64x256xf32>
    %28 = arith.select %26, %24, %27 : vector<64x256xi1>, vector<64x256xf32>
    %29 = arith.truncf %28 : vector<64x256xf32> to vector<64x256xbf16>
    %c2 = arith.constant 2 : index
    %c0_14 = arith.constant 0 : index
    %c0_15 = arith.constant 0 : index
    %30 = vector.load %arg2[%c2, %c0_14, %c0_15] : memref<3x256x256xbf16, #tpu.memory_space<vmem>>, vector<1x256x256xbf16>
    %31 = vector.shape_cast %30 : vector<1x256x256xbf16> to vector<256x256xbf16>
    %cst_16 = arith.constant dense<0.000000e+00> : vector<64x256xf32>
    %32 = tpu.matmul %29, %31, %cst_16 {dimension_numbers = #tpu.dot_dimension_numbers<[1], [0], [0], [1], [0, 0, 1, 1], [], []>} : vector<64x256xbf16>, vector<256x256xbf16>, vector<64x256xf32> -> vector<64x256xf32>
    %33 = arith.addf %23, %32 : vector<64x256xf32>
    %c0_17 = arith.constant 0 : index
    %c0_18 = arith.constant 0 : index
    %34 = vector.load %arg3[%c0_17, %c0_18] : memref<1x256xf32, #tpu.memory_space<vmem>>, vector<1x256xf32>
    %35 = vector.broadcast %34 : vector<1x256xf32> to vector<64x256xf32>
    %36 = arith.addf %33, %35 : vector<64x256xf32>
    %cst_19 = arith.constant 0.000000e+00 : f32
    %37 = vector.broadcast %cst_19 : f32 to vector<64x256xf32>
    %38 = arith.maximumf %36, %37 : vector<64x256xf32>
    %39 = arith.truncf %38 : vector<64x256xf32> to vector<64x256xbf16>
    %c0_20 = arith.constant 0 : index
    %c0_21 = arith.constant 0 : index
    %40 = vector.load %arg4[%c0_20, %c0_21] : memref<256x256xbf16, #tpu.memory_space<vmem>>, vector<256x256xbf16>
    %cst_22 = arith.constant dense<0.000000e+00> : vector<64x256xf32>
    %41 = tpu.matmul %39, %40, %cst_22 {dimension_numbers = #tpu.dot_dimension_numbers<[1], [0], [0], [1], [0, 0, 1, 1], [], []>} : vector<64x256xbf16>, vector<256x256xbf16>, vector<64x256xf32> -> vector<64x256xf32>
    %c0_23 = arith.constant 0 : index
    %c0_24 = arith.constant 0 : index
    %42 = vector.load %arg5[%c0_23, %c0_24] : memref<1x256xf32, #tpu.memory_space<vmem>>, vector<1x256xf32>
    %43 = vector.broadcast %42 : vector<1x256xf32> to vector<64x256xf32>
    %44 = arith.addf %41, %43 : vector<64x256xf32>
    %c8_25 = arith.constant 8 : index
    %c0_26 = arith.constant 0 : index
    %45 = vector.load %arg12[%c8_25, %c0_26] : memref<80x256xf32, #tpu.memory_space<vmem>>, vector<64x256xf32>
    tpu.vector_store %arg12[%c8_25, %c0_26], %44 {strides = array<i32>} : memref<80x256xf32, #tpu.memory_space<vmem>>, vector<64x256xf32>,
    %c8_27 = arith.constant 8 : index
    %c0_28 = arith.constant 0 : index
    %46 = vector.load %arg12[%c8_27, %c0_28] : memref<80x256xf32, #tpu.memory_space<vmem>>, vector<64x256xf32>
    %47 = arith.truncf %46 : vector<64x256xf32> to vector<64x256xbf16>
    %c1_29 = arith.constant 1 : index
    %c0_30 = arith.constant 0 : index
    %c0_31 = arith.constant 0 : index
    %48 = vector.load %arg6[%c1_29, %c0_30, %c0_31] : memref<3x256x256xbf16, #tpu.memory_space<vmem>>, vector<1x256x256xbf16>
    %49 = vector.shape_cast %48 : vector<1x256x256xbf16> to vector<256x256xbf16>
    %cst_32 = arith.constant dense<0.000000e+00> : vector<64x256xf32>
    %50 = tpu.matmul %47, %49, %cst_32 {dimension_numbers = #tpu.dot_dimension_numbers<[1], [0], [0], [1], [0, 0, 1, 1], [], []>} : vector<64x256xbf16>, vector<256x256xbf16>, vector<64x256xf32> -> vector<64x256xf32>
    %c7_33 = arith.constant 7 : index
    %c0_34 = arith.constant 0 : index
    %51 = vector.load %arg12[%c7_33, %c0_34] : memref<80x256xf32, #tpu.memory_space<vmem>>, vector<64x256xf32>
    %cst_35 = arith.constant 0.000000e+00 : f32
    %52 = vector.shape_cast %6 : vector<64x1xi1> to vector<64x1xi1>
    %53 = vector.broadcast %52 : vector<64x1xi1> to vector<64x256xi1>
    %54 = vector.broadcast %cst_35 : f32 to vector<64x256xf32>
    %55 = arith.select %53, %51, %54 : vector<64x256xi1>, vector<64x256xf32>
    %56 = arith.truncf %55 : vector<64x256xf32> to vector<64x256xbf16>
    %c0_36 = arith.constant 0 : index
    %c0_37 = arith.constant 0 : index
    %c0_38 = arith.constant 0 : index
    %57 = vector.load %arg6[%c0_36, %c0_37, %c0_38] : memref<3x256x256xbf16, #tpu.memory_space<vmem>>, vector<1x256x256xbf16>
    %58 = vector.shape_cast %57 : vector<1x256x256xbf16> to vector<256x256xbf16>
    %cst_39 = arith.constant dense<0.000000e+00> : vector<64x256xf32>
    %59 = tpu.matmul %56, %58, %cst_39 {dimension_numbers = #tpu.dot_dimension_numbers<[1], [0], [0], [1], [0, 0, 1, 1], [], []>} : vector<64x256xbf16>, vector<256x256xbf16>, vector<64x256xf32> -> vector<64x256xf32>
    %60 = arith.addf %50, %59 : vector<64x256xf32>
    %c9_40 = arith.constant 9 : index
    %c0_41 = arith.constant 0 : index
    %61 = vector.load %arg12[%c9_40, %c0_41] : memref<80x256xf32, #tpu.memory_space<vmem>>, vector<64x256xf32>
    %cst_42 = arith.constant 0.000000e+00 : f32
    %62 = vector.shape_cast %8 : vector<64x1xi1> to vector<64x1xi1>
    %63 = vector.broadcast %62 : vector<64x1xi1> to vector<64x256xi1>
    %64 = vector.broadcast %cst_42 : f32 to vector<64x256xf32>
    %65 = arith.select %63, %61, %64 : vector<64x256xi1>, vector<64x256xf32>
    %66 = arith.truncf %65 : vector<64x256xf32> to vector<64x256xbf16>
    %c2_43 = arith.constant 2 : index
    %c0_44 = arith.constant 0 : index
    %c0_45 = arith.constant 0 : index
    %67 = vector.load %arg6[%c2_43, %c0_44, %c0_45] : memref<3x256x256xbf16, #tpu.memory_space<vmem>>, vector<1x256x256xbf16>
    %68 = vector.shape_cast %67 : vector<1x256x256xbf16> to vector<256x256xbf16>
    %cst_46 = arith.constant dense<0.000000e+00> : vector<64x256xf32>
    %69 = tpu.matmul %66, %68, %cst_46 {dimension_numbers = #tpu.dot_dimension_numbers<[1], [0], [0], [1], [0, 0, 1, 1], [], []>} : vector<64x256xbf16>, vector<256x256xbf16>, vector<64x256xf32> -> vector<64x256xf32>
    %70 = arith.addf %60, %69 : vector<64x256xf32>
    %c0_47 = arith.constant 0 : index
    %c0_48 = arith.constant 0 : index
    %71 = vector.load %arg7[%c0_47, %c0_48] : memref<1x256xf32, #tpu.memory_space<vmem>>, vector<1x256xf32>
    %72 = vector.broadcast %71 : vector<1x256xf32> to vector<64x256xf32>
    %73 = arith.addf %70, %72 : vector<64x256xf32>
    %cst_49 = arith.constant 0.000000e+00 : f32
    %74 = vector.broadcast %cst_49 : f32 to vector<64x256xf32>
    %75 = arith.maximumf %73, %74 : vector<64x256xf32>
    %76 = arith.truncf %75 : vector<64x256xf32> to vector<64x256xbf16>
    %c0_50 = arith.constant 0 : index
    %c0_51 = arith.constant 0 : index
    %77 = vector.load %arg8[%c0_50, %c0_51] : memref<256x256xbf16, #tpu.memory_space<vmem>>, vector<256x256xbf16>
    %cst_52 = arith.constant dense<0.000000e+00> : vector<64x256xf32>
    %78 = tpu.matmul %76, %77, %cst_52 {dimension_numbers = #tpu.dot_dimension_numbers<[1], [0], [0], [1], [0, 0, 1, 1], [], []>} : vector<64x256xbf16>, vector<256x256xbf16>, vector<64x256xf32> -> vector<64x256xf32>
    %c0_53 = arith.constant 0 : index
    %c0_54 = arith.constant 0 : index
    %79 = vector.load %arg9[%c0_53, %c0_54] : memref<1x256xf32, #tpu.memory_space<vmem>>, vector<1x256xf32>
    %80 = vector.broadcast %79 : vector<1x256xf32> to vector<64x256xf32>
    %81 = arith.addf %78, %80 : vector<64x256xf32>
    %82 = arith.addf %81, %0 : vector<64x256xf32>
    %c0_55 = arith.constant 0 : index
    %c0_56 = arith.constant 0 : index
    %83 = vector.load %arg10[%c0_55, %c0_56] : memref<64x256xf32, #tpu.memory_space<vmem>>, vector<64x256xf32>
    tpu.vector_store %arg10[%c0_55, %c0_56], %82 {strides = array<i32>} : memref<64x256xf32, #tpu.memory_space<vmem>>, vector<64x256xf32>,
    return
  }
  func.func @transform_0(%arg0: i32) -> (i32, i32) {
    %c0_i32 = arith.constant 0 : i32
    %c0_i32_0 = arith.constant 0 : i32
    return %arg0, %c0_i32 : i32, i32
  }
  func.func @transform_1(%arg0: i32) -> (i32, i32, i32) {
    %c0_i32 = arith.constant 0 : i32
    %c0_i32_0 = arith.constant 0 : i32
    %c0_i32_1 = arith.constant 0 : i32
    %c0_i32_2 = arith.constant 0 : i32
    return %c0_i32, %c0_i32_0, %c0_i32_1 : i32, i32, i32
  }
  func.func @transform_2(%arg0: i32) -> (i32, i32) {
    %c0_i32 = arith.constant 0 : i32
    %c0_i32_0 = arith.constant 0 : i32
    %c0_i32_1 = arith.constant 0 : i32
    return %c0_i32, %c0_i32_0 : i32, i32
  }
  func.func @transform_3(%arg0: i32) -> (i32, i32) {
    %c0_i32 = arith.constant 0 : i32
    %c0_i32_0 = arith.constant 0 : i32
    %c0_i32_1 = arith.constant 0 : i32
    return %c0_i32, %c0_i32_0 : i32, i32
  }
  func.func @transform_4(%arg0: i32) -> (i32, i32) {
    %c0_i32 = arith.constant 0 : i32
    %c0_i32_0 = arith.constant 0 : i32
    %c0_i32_1 = arith.constant 0 : i32
    return %c0_i32, %c0_i32_0 : i32, i32
  }
  func.func @transform_5(%arg0: i32) -> (i32, i32, i32) {
    %c0_i32 = arith.constant 0 : i32
    %c0_i32_0 = arith.constant 0 : i32
    %c0_i32_1 = arith.constant 0 : i32
    %c0_i32_2 = arith.constant 0 : i32
    return %c0_i32, %c0_i32_0, %c0_i32_1 : i32, i32, i32
  }
  func.func @transform_6(%arg0: i32) -> (i32, i32) {
    %c0_i32 = arith.constant 0 : i32
    %c0_i32_0 = arith.constant 0 : i32
    %c0_i32_1 = arith.constant 0 : i32
    return %c0_i32, %c0_i32_0 : i32, i32
  }
  func.func @transform_7(%arg0: i32) -> (i32, i32) {
    %c0_i32 = arith.constant 0 : i32
    %c0_i32_0 = arith.constant 0 : i32
    %c0_i32_1 = arith.constant 0 : i32
    return %c0_i32, %c0_i32_0 : i32, i32
  }
  func.func @transform_8(%arg0: i32) -> (i32, i32) {
    %c0_i32 = arith.constant 0 : i32
    %c0_i32_0 = arith.constant 0 : i32
    %c0_i32_1 = arith.constant 0 : i32
    return %c0_i32, %c0_i32_0 : i32, i32
  }
  func.func @transform_9(%arg0: i32) -> (i32, i32) {
    %c0_i32 = arith.constant 0 : i32
    %c0_i32_0 = arith.constant 0 : i32
    return %arg0, %c0_i32 : i32, i32
  }
}

</mosaic_0001>

<bundles_post_ra>
// kernel: tpu_custom_call.1
= control target key start
LH: loop header
LB: loop body
LE: loop exit
PB: predicated region body
PF: predicated region fallthrough
CT: control target
= control target key end

     0   :  { %s5518_s0 = inlined_call_operand.hbm [shape: f32[128,256], index: 0, kind: input, shape index: {}]   ;;  %s5519_s1 = inlined_call_operand.hbm [shape: bf16[3,256,256], index: 1, kind: input, shape index: {}]   ;;  %s5520_s2 = inlined_call_operand.vmem [shape: f32[1,256], index: 2, kind: input, shape index: {}]   ;;  %s5521_s3 = inlined_call_operand.hbm [shape: bf16[256,256], index: 3, kind: input, shape index: {}]   ;;  %s5522_s4 = inlined_call_operand.vmem [shape: f32[1,256], index: 4, kind: input, shape index: {}]   ;;  %s5523_s5 = inlined_call_operand.hbm [shape: bf16[3,256,256], index: 5, kind: input, shape index: {}]   ;;  %s5524_s6 = inlined_call_operand.vmem [shape: f32[1,256], index: 6, kind: input, shape index: {}]   ;;  %s5525_s7 = inlined_call_operand.hbm [shape: bf16[256,256], index: 7, kind: input, shape index: {}]   ;;  %s5526_s8 = inlined_call_operand.vmem [shape: f32[1,256], index: 8, kind: input, shape index: {}]   ;;  %s5527_s9 = inlined_call_operand.hbm [shape: f32[128,256], index: 9, kind: output, shape index: {}]  }
   0x1   :  { %5534 = sst [smem:[#allocation20_spill]] %s5527_s9 }
   0x2   :  { %14 = vsyncpa [#allocation5], 0 }
   0x3   :  { %16 = vsyncpa [#allocation5 + $0x1], 0 }
   0x4   :  { %17 = vsyncpa [#allocation8], 0 }
   0x5   :  { %18 = vsyncpa [#allocation11], 0 }
   0x6   :  { %19 = vsyncpa [#allocation6], 0 }
   0x7   :  { %21 = vsyncpa [#allocation6 + $0x1], 0  ;;  %s4656_s30 = smov 0   ;;  %s4658_s10 = smov 0  }
   0x8   :  { %s4660_s11 = smov 0   ;;  %s4662_s12 = smov 0  }
   0x9 LB: > { %5535 = sst [smem:[#allocation18_spill]] %s4579_s30  ;;  %s4677_s13 = sadd.s32 4294967295, %s4591_s12   ;;  %s4591_s12 = sphi %s4662_s12, %s5588_s12   ;;  %s4587_s11 = sphi %s4660_s11, %s5587_s11   ;;  %s4583_s10 = sphi %s4658_s10, %s5586_s10   ;;  %s4579_s30 = sphi %s4656_s30, %s5585_s30  }
   0xa   : > { %s3429_s14 = sadd.s32 4294967294, %s4591_s12   ;;  %p47_p0 = scmp.ne.s32.totalorder %s4583_s10, %s4579_s30 }
   0xb   : > { %p5528_p1 = scmp.eq.s32.totalorder %s4677_s13, 0  ;;  %p245_p3 = scmp.eq.s32.totalorder %s3429_s14, 1 }
   0xc   : > { %p3430_p5 = scmp.ge.s32.totalorder %s4591_s12, 1  ;;  %p252_p7 = scmp.lt.s32.totalorder %s4591_s12, 3 }
   0xd   : > { %p4686_p4 = por %p5528_p1, %p47_p0  ;;  %p4691_p6 = por %p245_p3, %p47_p0 }
   0xe   : > { %p4696_p8 = pnand %p3430_p5, %p252_p7  ;;  %s4593_s18 = smov [#allocation7]  }
   0xf   : > { %s5536_s15 = scalar_select %p4686_p4, 1, 0 }
  0x10   : > { %s5537_s16 = scalar_select %p4691_p6, 1, 0 }
  0x11   : > { %s5539_s17 = scalar_select %p4696_p8, 1, 0 }
  0x12   : > { %5538 = sst [smem:[#allocation19_spill]] %s5537_s16  ;;  %s264_s19 = sshll.u32 %s4593_s18, 4  ;;  %s4700_s19 = int_to_ptr.vmem [resolvable:$true] %s264_s19 }
  0x13   : > { %p3893_p9 = pneg %p4696_p8  ;;  %s4594_s21 = smov [#allocation10]  }
  0x14   : > { %s296_s22 = sshll.u32 %s4594_s21, 4  ;;  %s4595_s23 = smov [#allocation9]   ;;  %s4711_s22 = int_to_ptr.vmem [resolvable:$true] %s296_s22 }
  0x15   : > { %p4707_p11 = pnand %p3893_p9, %p5528_p1  ;;  %s4713_s24 = sshll.u32 %s4595_s23, 4  ;;  %s281_s24 = int_to_ptr.vmem [resolvable:$true] %s4713_s24 }
  0x16   : > { %s4375_s27 = scalar_lea.hbm %s5519_s1, 12288 }
  0x17   : > { %p4376_p12 = scmp.ne.s32.totalorder %s5519_s1, %s4375_s27  ;;  %p4723_p13 = pneg %p4707_p11 }
  0x18   : > { %p4382_p5 = scmp.lt.u32.totalorder %s4375_s27, %s5519_s1 }
  0x19   : > { %p4378_p0 = pnand %p4723_p13, %p4376_p12 }
  0x1b   : > { %p4379_p3 = pneg %p4378_p0 }
  0x1d   : > { %p4384_p7 = pnand %p4382_p5, %p4379_p3 }
  0x1f   : > { %4387 = shalt.err (!%p4384_p7)
}
  0x20   : > { %s4388_s23 = scalar_lea.vmem %s4700_s19, 12288  ;;  %p4396_p2 = scmp.lt.s32.totalorder %s4700_s19, %s4700_s19 }
  0x21   : > { %p4389_p9 = scmp.ne.s32.totalorder %s4700_s19, %s4388_s23  ;;  %p4397_p6 = scmp.lt.s32.totalorder %s4388_s23, %s4388_s23 }
  0x23   : > { %p4391_p10 = pnand %p4389_p9, %p4723_p13  ;;  %p4398_p12 = por %p4397_p6, %p4396_p2 }
  0x25   : > { %p4392_p1 = pneg %p4391_p10 }
  0x27   : > { %p4399_p0 = pnand %p4398_p12, %p4392_p1 }
  0x29   : > { %4402 = shalt.err (!%p4399_p0)
}
  0x2a   : > { %s4596_s25 = smov 128   ;;  %s4597_s26 = smov 8  }
  0x2b   : > { %3896 = dma.hbm_to_vmem [thread:$0]  (!%p4707_p11), %s5519_s1, 12288, %s4700_s19, [#allocation8], %s4596_s25, %s4596_s25, %s4597_s26  }
  0x2c   : > { %s4403_s21 = scalar_lea.hbm %s5523_s5, 12288 }
  0x2d   : > { %p4404_p1 = scmp.ne.s32.totalorder %s5523_s5, %s4403_s21  ;;  %p4410_p10 = scmp.lt.u32.totalorder %s4403_s21, %s5523_s5 }
  0x2f   : > { %p4406_p2 = pnand %p4404_p1, %p4723_p13 }
  0x31   : > { %p4407_p6 = pneg %p4406_p2 }
  0x33   : > { %p4412_p3 = pnand %p4410_p10, %p4407_p6 }
  0x35   : > { %4415 = shalt.err (!%p4412_p3)
}
  0x36   : > { %s4416_s19 = scalar_lea.vmem %s4711_s22, 12288  ;;  %p4424_p12 = scmp.lt.s32.totalorder %s4711_s22, %s4711_s22 }
  0x37   : > { %p4417_p5 = scmp.ne.s32.totalorder %s4711_s22, %s4416_s19  ;;  %p4425_p0 = scmp.lt.s32.totalorder %s4416_s19, %s4416_s19 }
  0x39   : > { %p4419_p7 = pnand %p4417_p5, %p4723_p13  ;;  %p4426_p1 = por %p4425_p0, %p4424_p12 }
  0x3b   : > { %p4420_p9 = pneg %p4419_p7 }
  0x3d   : > { %p4427_p2 = pnand %p4426_p1, %p4420_p9 }
  0x3f   : > { %4430 = shalt.err (!%p4427_p2)
}
  0x40   : > { %3902 = dma.hbm_to_vmem [thread:$0]  (!%p4707_p11), %s5523_s5, 12288, %s4711_s22, [#allocation11], %s4596_s25, %s4596_s25, %s4597_s26  }
  0x41   : > { %s4431_s28 = scalar_lea.hbm %s5521_s3, 4096 }
  0x42   : > { %p4432_p6 = scmp.ne.s32.totalorder %s5521_s3, %s4431_s28  ;;  %p4438_p5 = scmp.lt.u32.totalorder %s4431_s28, %s5521_s3 }
  0x44   : > { %p4434_p10 = pnand %p4432_p6, %p4723_p13 }
  0x46   : > { %p4435_p3 = pneg %p4434_p10 }
  0x48   : > { %p4440_p7 = pnand %p4438_p5, %p4435_p3 }
  0x4a   : > { %4443 = shalt.err (!%p4440_p7)
}
  0x4b   : > { %s4444_s19 = scalar_lea.vmem %s281_s24, 4096  ;;  %p4452_p1 = scmp.lt.s32.totalorder %s281_s24, %s281_s24 }
  0x4c   : > { %p4445_p9 = scmp.ne.s32.totalorder %s281_s24, %s4444_s19  ;;  %p4453_p2 = scmp.lt.s32.totalorder %s4444_s19, %s4444_s19 }
  0x4e   : > { %p4447_p12 = pnand %p4445_p9, %p4723_p13  ;;  %p4454_p4 = por %p4453_p2, %p4452_p1 }
  0x50   : > { %p4448_p0 = pneg %p4447_p12 }
  0x52   : > { %p4455_p8 = pnand %p4454_p4, %p4448_p0 }
  0x54   : > { %4458 = shalt.err (!%p4455_p8)
}
  0x55   : > { %3899 = dma.hbm_to_vmem [thread:$0]  (!%p4707_p11), %s5521_s3, 4096, %s281_s24, [#allocation8], %s4596_s25, %s4596_s25, %s4597_s26  }
  0x56   : > { %s4598_s30 = smov [#allocation12]   ;;  %s4459_s29 = scalar_lea.hbm %s5525_s7, 4096 }
  0x57   : > { %s312_s16 = sshll.u32 %s4598_s30, 4  ;;  %p4460_p4 = scmp.ne.s32.totalorder %s5525_s7, %s4459_s29  ;;  %s313_s16 = int_to_ptr.vmem [resolvable:$true] %s312_s16 }
  0x58   : > { %p4466_p10 = scmp.lt.u32.totalorder %s4459_s29, %s5525_s7 }
  0x59   : > { %p4462_p8 = pnand %p4460_p4, %p4723_p13 }
  0x5b   : > { %p4463_p6 = pneg %p4462_p8 }
  0x5d   : > { %p4468_p3 = pnand %p4466_p10, %p4463_p6 }
  0x5f   : > { %4471 = shalt.err (!%p4468_p3)
}
  0x60   : > { %s4472_s24 = scalar_lea.vmem %s313_s16, 4096  ;;  %p4480_p12 = scmp.lt.s32.totalorder %s313_s16, %s313_s16 }
  0x61   : > { %p4473_p5 = scmp.ne.s32.totalorder %s313_s16, %s4472_s24  ;;  %p4481_p0 = scmp.lt.s32.totalorder %s4472_s24, %s4472_s24 }
  0x63   : > { %p4475_p7 = pnand %p4473_p5, %p4723_p13  ;;  %p4482_p1 = por %p4481_p0, %p4480_p12 }
  0x65   : > { %p4476_p9 = pneg %p4475_p7 }
  0x67   : > { %p4483_p2 = pnand %p4482_p1, %p4476_p9 }
  0x69   : > { %4486 = shalt.err (!%p4483_p2)
}
  0x6a   : > { %3905 = dma.hbm_to_vmem [thread:$0]  (!%p4707_p11), %s5525_s7, 4096, %s313_s16, [#allocation11], %s4596_s25, %s4596_s25, %s4597_s26  }
  0x6b   : > { %s4817_s14 = sadd.s32 1, %s4591_s12   ;;  %s34_s20 = sadd.s32 1, %s4587_s11 }
  0x6c   : > { %s31_s30 = ssub.s32 %s4591_s12, %s4817_s14  ;;  %p41_p13 = scmp.ne.s32.totalorder %s4587_s11, %s4583_s10 }
  0x6d   : > { %p32_p4 = scmp.eq.s32.totalorder %s31_s30, 0  ;;  %p42_p8 = scmp.eq.s32.totalorder %s4591_s12, 0 }
  0x6e   : > { %p5542_p6 = scmp.eq.s32.totalorder %s4677_s13, 1  ;;  %p3918_p3 = scmp.lt.s32.totalorder %s4591_s12, 2 }
  0x6f   : > { %s4833_s28 = scalar_select %p32_p4, %s4587_s11, %s34_s20  }
  0x70   : > { %p4827_p10 = por %p5542_p6, %p41_p13  ;;  %p43_p5 = por %p42_p8, %p41_p13 }
  0x71   : > { %s329_s29 = sand.u32 1, %s4587_s11   ;;  %s3806_s25 = sshll.u32 %s4591_s12, 11 }
  0x72   : > { %s3436_s18 = sshll.u32 %s329_s29, 7  ;;  %s4840_s21 = scalar_lea.hbm %s5518_s0, %s3806_s25 }
  0x73   : > { %s333_s23 = scalar_lea.vmem [#allocation4], %s3436_s18  ;;  %p4844_p11 = pnand %p3918_p3, %p43_p5 }
  0x74   : > { %s341_s19 = sshll.u32 %s333_s23, 4  ;;  %s4848_s22 = scalar_lea.sflag [#allocation5], %s329_s29  ;;  %s4842_s19 = int_to_ptr.vmem [resolvable:$true] %s341_s19 }
  0x75   : > { %s4487_s9 = scalar_lea.hbm %s4840_s21, 2048  ;;  %p4489_p9 = pneg %p4844_p11 }
  0x76   : > { %p4488_p7 = scmp.ne.s32.totalorder %s4840_s21, %s4487_s9  ;;  %s4492_s18 = scalar_lea.hbm %s5518_s0, 4096 }
  0x77   : > { %p4493_p1 = scmp.lt.u32.totalorder %s4840_s21, %s5518_s0  ;;  %p4494_p2 = scmp.lt.u32.totalorder %s4492_s18, %s4487_s9 }
  0x78   : > { %p4490_p12 = pnand %p4489_p9, %p4488_p7  ;;  %p4496_p4 = scmp.lt.u32.totalorder %s4487_s9, %s4840_s21 }
  0x79   : > { %p4495_p13 = por %p4494_p2, %p4493_p1 }
  0x7a   : > { %p4491_p0 = pneg %p4490_p12 }
  0x7b   : > { %p4497_p8 = por %p4496_p4, %p4495_p13 }
  0x7d   : > { %p4498_p6 = pnand %p4497_p8, %p4491_p0 }
  0x7f   : > { %4501 = shalt.err (!%p4498_p6)
}
  0x80   : > { %s4502_s29 = scalar_lea.vmem %s4842_s19, 2048  ;;  %s4599_s16 = smov [#allocation4]  }
  0x81   : > { %p4503_p3 = scmp.ne.s32.totalorder %s4842_s19, %s4502_s29  ;;  %s4507_s23 = sshll.u32 %s4599_s16, 4  ;;  %s4508_s23 = int_to_ptr.vmem [resolvable:$false] %s4507_s23 }
  0x82   : > { %s4509_s20 = scalar_lea.vmem %s4508_s23, 4096  ;;  %p4510_p12 = scmp.lt.s32.totalorder %s4842_s19, %s4508_s23 }
  0x83   : > { %p4505_p5 = pnand %p4503_p3, %p4489_p9  ;;  %p4511_p1 = scmp.lt.s32.totalorder %s4509_s20, %s4502_s29 }
  0x85   : > { %p4506_p7 = pneg %p4505_p5  ;;  %p4512_p2 = por %p4511_p1, %p4510_p12 }
  0x87   : > { %p4513_p13 = pnand %p4512_p2, %p4506_p7 }
  0x89   : > { %4516 = shalt.err (!%p4513_p13)
}
  0x8a   : > { %s4600_s9 = smov 256   ;;  %s4601_s30 = smov 16  }
  0x8b   : > { %3909 = dma.hbm_to_vmem [thread:$0]  (!%p4844_p11), %s4840_s21, 2048, %s4842_s19, %s4848_s22, %s4600_s9, %s4600_s9, %s4601_s30  }
  0x8c   : > { %p5545_p9 = scmp.ne.s32.totalorder %s5539_s17, 0 }
  0x8d   : > { %s4879_s18 = sand.u32 (!%p5545_p9), 1, %s4583_s10   ;;  %p5546_p0 = scmp.ne.s32.totalorder (!%p5545_p9), %s5536_s15, 0 }
  0x8e   : > { %353 = sbr.rel (%p5545_p9) target bundleno = 1403 (0x57b), region = 56  ;;  %s3441_s25 = sshll.u32 (!%p5545_p9), %s4879_s18, 7 }
  0x8f   : > { %s356_s26 = scalar_lea.sflag (!%p5545_p9), [#allocation5], %s4879_s18  ;;  %s4885_s29 = scalar_lea.vmem (!%p5545_p9), [#allocation4], %s3441_s25 }
  0x95   : > { %4562 = dma.done.wait (%p5546_p0), %s356_s26, 2048  }
  0x96   : > { %4564 = vsyncadd (%p5546_p0), %s356_s26, 4294965248  ;;  %p5547_p11 = scmp.eq.s32.totalorder %s4677_s13, 0 }
  0x98   : > { %4566 = dma.done.wait (%p5547_p11), [#allocation8], 16384   ;;  %p5548_p4 = pmov %p5547_p11 }
  0x9a   : > { %4568 = vsyncadd (%p5548_p4), [#allocation8], 4294950912  ;;  %p5549_p8 = pmov %p5548_p4 }
  0x9b   : > { %p5550_p6 = pmov %p5548_p4 }
  0x9c   : > { %4570 = dma.done.wait (%p5549_p8), [#allocation11], 16384  }
  0x9d   : > { %4572 = vsyncadd (%p5550_p6), [#allocation11], 4294950912  ;;  %v3967_v0 = vld [vmem:[#allocation7 + $0x4] ss:$8 sps:$4 sm:$0xff]   ;;  %v3969_v1 = vld [vmem:[#allocation7] ss:$8 sps:$4 sm:$0xff]   ;;  %v444_v7 = vlaneseq }
  0x9e   : > { %839 = vmatprep.subr.bf16.mxu0 %v3967_v0  ;;  %v3970_v2 = vld [vmem:[#allocation7 + $0x14] ss:$8 sps:$4 sm:$0xff]   ;;  %v3972_v3 = vld [vmem:[#allocation7 + $0x10] ss:$8 sps:$4 sm:$0xff]   ;;  %v3973_v4 = vld [vmem:[#allocation7 + $0x24] ss:$8 sps:$4 sm:$0xff]  }
  0x9f   : > { %840 = vmatpush1.bf16.msra.mxu0 %v3969_v1  ;;  %v3975_v5 = vld [vmem:[#allocation7 + $0x20] ss:$8 sps:$4 sm:$0xff]   ;;  %v3976_v6 = vld [vmem:[#allocation7 + $0x34] ss:$8 sps:$4 sm:$0xff]   ;;  %v3978_v8 = vld [vmem:[#allocation7 + $0x30] ss:$8 sps:$4 sm:$0xff]  }
  0xa0   : > { %841 = vmatprep.subr.bf16.mxu0 %v3970_v2  ;;  %v3979_v9 = vld [vmem:[#allocation7 + $0x44] ss:$8 sps:$4 sm:$0xff]   ;;  %v4899_v10 = vshrl.u32 %v444_v7, 7  ;;  %v3981_v11 = vld [vmem:[#allocation7 + $0x40] ss:$8 sps:$4 sm:$0xff]   ;;  %v4906_v17 = vld [vmem:[%s4885_s29 + $0x18] sm:$0xff] }
  0xa1   : > { %v3982_v12 = vld [vmem:[#allocation7 + $0x54] ss:$8 sps:$4 sm:$0xff]   ;;  %v3984_v14 = vld [vmem:[#allocation7 + $0x50] ss:$8 sps:$4 sm:$0xff]   ;;  %v3985_v15 = vld [vmem:[#allocation7 + $0x64] ss:$8 sps:$4 sm:$0xff]  }
  0xa2   : > { %v453_v13 = vand.u32 15, %v4899_v10  ;;  %v4903_v16 = vld [vmem:[%s4885_s29 + $0x8] sm:$0xff]  ;;  %vm572_vm1 = vcmask 1040384   ;;  %431 = vst [vmem:[#allocation2 + $0x28] sm:$0xff] %v4906_v17  ;;  %v581_v20 = vrot.slane %v4906_v17, 7  ;;  %vm4602_vm2 = vmmov 1  }
  0xa3   : > { %842 = vmatpush1.bf16.msra.mxu0 %v3972_v3  ;;  %429 = vst [vmem:[#allocation2 + $0x18] sm:$0xff] %v4903_v16  ;;  %v535_v18 = vld [vmem:[#allocation2 + $0x8] sm:$0x80]  ;;  %v577_v19 = vrot.slane %v4903_v16, 7  ;;  %v3987_v21 = vld [vmem:[#allocation7 + $0x60] ss:$8 sps:$4 sm:$0xff]  }
  0xa4   : > { %843 = vmatprep.subr.bf16.mxu0 %v3973_v4  ;;  %vm461_vm0 = vcmp.ge.s32.totalorder %v453_v13, 1  ;;  %v3988_v22 = vld [vmem:[#allocation7 + $0x74] ss:$8 sps:$4 sm:$0xff]   ;;  %v576_v23 = vrot.slane %v535_v18, 7  ;;  %v4921_v26 = vld [vmem:[%s4885_s29] sm:$0xff]  ;;  %v4932_v36 = vld [vmem:[%s4885_s29 + $0x28] sm:$0xff] }
  0xa5   : > { %v582_v24 = vsel %vm572_vm1, %v577_v19, %v581_v20  ;;  %vm4916_vm3 = vmpackc.low %vm4602_vm2, %vm461_vm0  ;;  %v4924_v27 = vld [vmem:[%s4885_s29 + $0x10] sm:$0xff]  ;;  %428 = vst [vmem:[#allocation2 + $0x10] sm:$0xff] %v4921_v26  ;;  %v3991_v31 = vld [vmem:[#allocation7 + $0x84] ss:$8 sps:$4 sm:$0xff]   ;;  %v447_v57 = vadd.s32 16, %v4899_v10  ;;  %v574_v60 = vrot.slane %v4921_v26, 7 }
  0xa6   : > { %v578_v28 = vsel %vm572_vm1, %v576_v23, %v577_v19  ;;  %430 = vst [vmem:[#allocation2 + $0x20] sm:$0xff] %v4924_v27  ;;  %v3990_v30 = vld [vmem:[#allocation7 + $0x70] ss:$8 sps:$4 sm:$0xff]   ;;  %v3993_v32 = vld [vmem:[#allocation7 + $0x80] ss:$8 sps:$4 sm:$0xff]   ;;  %433 = vst [vmem:[#allocation2 + $0x38] sm:$0xff] %v4932_v36 }
  0xa7   : > { %844 = vmatpush1.bf16.msra.mxu0 %v3975_v5  ;;  %v3480_v29 = vpack.c.bf16 %v582_v24, %v578_v28  ;;  %v3994_v33 = vld [vmem:[#allocation7 + $0x94] ss:$8 sps:$4 sm:$0xff]   ;;  %v3996_v34 = vld [vmem:[#allocation7 + $0x90] ss:$8 sps:$4 sm:$0xff]   ;;  %v3997_v35 = vld [vmem:[#allocation7 + $0xa4] ss:$8 sps:$4 sm:$0xff]  }
  0xa8   : > { %845 = vmatprep.subr.bf16.mxu0 %v3976_v6  ;;  %v4935_v37 = vld [vmem:[%s4885_s29 + $0x38] sm:$0xff]  ;;  %v3999_v38 = vld [vmem:[#allocation7 + $0xa0] ss:$8 sps:$4 sm:$0xff]   ;;  %v4943_v40 = vld [vmem:[%s4885_s29 + $0x30] sm:$0xff]  ;;  %v579_v61 = vrot.slane %v4924_v27, 7  ;;  %v585_v63 = vrot.slane %v4932_v36, 7 }
  0xa9   : > { %3481 = vmatprep.mubr.msk.bf16.mxu0 %vm4916_vm3, %v3480_v29  ;;  %435 = vst [vmem:[#allocation2 + $0x48] sm:$0xff] %v4935_v37  ;;  %v4940_v39 = vld [vmem:[%s4885_s29 + $0x20] sm:$0xff]  ;;  %v4000_v41 = vld [vmem:[#allocation7 + $0xb4] ss:$8 sps:$4 sm:$0xff]   ;;  %434 = vst [vmem:[#allocation2 + $0x40] sm:$0xff] %v4943_v40  ;;  %v589_v0 = vrot.slane %v4935_v37, 7 }
  0xaa   : > { %432 = vst [vmem:[#allocation2 + $0x30] sm:$0xff] %v4940_v39  ;;  %v4948_v42 = vld [vmem:[%s4885_s29 + $0x48] sm:$0xff]  ;;  %v4951_v43 = vld [vmem:[%s4885_s29 + $0x58] sm:$0xff]  ;;  %v4956_v46 = vld [vmem:[%s4885_s29 + $0x40] sm:$0xff]  ;;  %v455_v1 = vand.u32 15, %v447_v57  ;;  %v580_v4 = vsel %vm572_vm1, %v574_v60, %v579_v61  ;;  %v586_v6 = vsel %vm572_vm1, %v581_v20, %v585_v63  ;;  %vm1197_vm10 = vcmask 1046528  }
  0xab   : > { %846 = vmatpush1.bf16.msra.mxu0 %v3978_v8  ;;  %437 = vst [vmem:[#allocation2 + $0x58] sm:$0xff] %v4948_v42  ;;  %439 = vst [vmem:[#allocation2 + $0x68] sm:$0xff] %v4951_v43  ;;  %v4002_v44 = vld [vmem:[#allocation7 + $0xb0] ss:$8 sps:$4 sm:$0xff]   ;;  %v4003_v45 = vld [vmem:[#allocation7 + $0xc4] ss:$8 sps:$4 sm:$0xff]   ;;  %v590_v7 = vsel %vm572_vm1, %v585_v63, %v589_v0 }
  0xac   : > { %847 = vmatprep.subr.bf16.mxu0 %v3979_v9  ;;  %v4959_v47 = vld [vmem:[%s4885_s29 + $0x50] sm:$0xff]  ;;  %436 = vst [vmem:[#allocation2 + $0x50] sm:$0xff] %v4956_v46  ;;  %v4964_v48 = vld [vmem:[%s4885_s29 + $0x68] sm:$0xff]  ;;  %v4967_v49 = vld [vmem:[%s4885_s29 + $0x78] sm:$0xff]  ;;  %vm463_vm4 = vcmp.ge.s32.totalorder %v455_v1, 1  ;;  %v449_v8 = vadd.s32 32, %v4899_v10  ;;  %v3486_v13 = vpack.c.bf16 %v590_v7, %v586_v6 }
  0xad   : > { %438 = vst [vmem:[#allocation2 + $0x60] sm:$0xff] %v4959_v47  ;;  %441 = vst [vmem:[#allocation2 + $0x78] sm:$0xff] %v4964_v48  ;;  %v4005_v50 = vld [vmem:[#allocation7 + $0xc0] ss:$8 sps:$4 sm:$0xff]   ;;  %v4006_v51 = vld [vmem:[#allocation7 + $0xd4] ss:$8 sps:$4 sm:$0xff]  }
  0xae   : > { %443 = vst [vmem:[#allocation2 + $0x88] sm:$0xff] %v4967_v49  ;;  %v4972_v52 = vld [vmem:[%s4885_s29 + $0x60] sm:$0xff]  ;;  %v4975_v53 = vld [vmem:[%s4885_s29 + $0x70] sm:$0xff]  ;;  %vm4994_vm5 = vmpackc.low %vm4602_vm2, %vm463_vm4  ;;  %v593_v19 = vrot.slane %v4948_v42, 7  ;;  %v597_v20 = vrot.slane %v4951_v43, 7  ;;  %s5437_s20 = scalar_lea.vmem [#allocation13], %s3441_s25 }
  0xaf   : > { %848 = vmatpush1.bf16.msra.mxu0 %v3981_v11  ;;  %440 = vst [vmem:[#allocation2 + $0x70] sm:$0xff] %v4972_v52  ;;  %442 = vst [vmem:[#allocation2 + $0x80] sm:$0xff] %v4975_v53  ;;  %v4008_v54 = vld [vmem:[#allocation7 + $0xd0] ss:$8 sps:$4 sm:$0xff]   ;;  %v4009_v55 = vld [vmem:[#allocation7 + $0xe4] ss:$8 sps:$4 sm:$0xff]  }
  0xb0   : > { %849 = vmatprep.subr.bf16.mxu0 %v3982_v12  ;;  %v534_v56 = vld [vmem:[#allocation2] sm:$0x80]  ;;  %v4011_v58 = vld [vmem:[#allocation7 + $0xe0] ss:$8 sps:$4 sm:$0xff]   ;;  %v4012_v62 = vld [vmem:[#allocation7 + $0xf4] ss:$8 sps:$4 sm:$0xff]   ;;  %v594_v29 = vsel %vm572_vm1, %v589_v0, %v593_v19 }
  0xb1   : > { %v573_v59 = vrot.slane %v534_v56, 7  ;;  %v4014_v2 = vld [vmem:[#allocation7 + $0xf0] ss:$8 sps:$4 sm:$0xff]   ;;  %v4017_v5 = vld [vmem:[#allocation7 + $0x104] ss:$8 sps:$4 sm:$0xff]   ;;  %s3808_s9 = sshll.u32 %s4677_s13, 11 }
  0xb2   : > { %v4015_v9 = vld [vmem:[#allocation7 + $0x100] ss:$8 sps:$4 sm:$0xff]   ;;  %v4020_v12 = vld [vmem:[#allocation7 + $0x114] ss:$8 sps:$4 sm:$0xff]   ;;  %v4023_v28 = vld [vmem:[#allocation7 + $0x124] ss:$8 sps:$4 sm:$0xff]  }
  0xb3   : > { %850 = vmatpush1.bf16.msra.mxu0 %v3984_v14  ;;  %v575_v3 = vsel %vm572_vm1, %v573_v59, %v574_v60  ;;  %v583_v14 = vrot.slane %v4940_v39, 7  ;;  %v4029_v56 = vld [vmem:[#allocation7 + $0x144] ss:$8 sps:$4 sm:$0xff]   ;;  %v4032_v63 = vld [vmem:[#allocation7 + $0x154] ss:$8 sps:$4 sm:$0xff]   ;;  %s3318_s30 = sshll.u32 %s5437_s20, 4  ;;  %s5471_s30 = int_to_ptr.vmem [resolvable:$true] %s3318_s30 }
  0xb4   : > { %851 = vmatprep.subr.bf16.mxu0 %v3985_v15  ;;  %v3483_v11 = vpack.c.bf16 %v580_v4, %v575_v3  ;;  %v587_v15 = vrot.slane %v4943_v40, 7  ;;  %v599_v3 = vrot.slane %v4972_v52, 7  ;;  %v4035_v6 = vld [vmem:[#allocation7 + $0x164] ss:$8 sps:$4 sm:$0xff]   ;;  %v4315_v1 = vld [vmem:[#allocation12 + $0x40] ss:$8 sps:$4 sm:$0xff]  }
  0xb5   : > { %v584_v23 = vsel %vm572_vm1, %v579_v61, %v583_v14  ;;  %s5580_s13 = sld [smem:[#allocation20_spill]]  ;;  %s3304_s15 = scalar_lea.sflag [#allocation6], %s4879_s18 }
  0xb6   : > { %v588_v24 = vsel %vm572_vm1, %v583_v14, %v587_v15  ;;  %v536_v57 = vld [vmem:[#allocation2 + $0x80] sm:$0x7f]  ;;  %s4517_s17 = scalar_lea.vmem %s5471_s30, 2048  ;;  %s4603_s21 = smov [#allocation13]  }
  0xb7   : > { %852 = vmatpush1.bf16.msra.mxu0 %v3987_v21  ;;  %v457_v21 = vand.u32 15, %v449_v8  ;;  %v603_v4 = vrot.slane %v536_v57, 7  ;;  %v4111_v14 = vld [vmem:[#allocation9 + $0x4] ss:$8 sps:$4 sm:$0xff]   ;;  %v4132_v57 = vld [vmem:[#allocation9 + $0x74] ss:$8 sps:$4 sm:$0xff]   ;;  %p4518_p3 = scmp.ne.s32.totalorder %s5471_s30, %s4517_s17 }
  0xb8   : > { %853 = vmatprep.subr.bf16.mxu0 %v3988_v22  ;;  %v4018_v22 = vld [vmem:[#allocation7 + $0x110] ss:$8 sps:$4 sm:$0xff]   ;;  %1810 = vmatprep.subr.bf16.mxu1 %v4111_v14  ;;  %s4521_s19 = sshll.u32 %s4603_s21, 4  ;;  %s4522_s19 = int_to_ptr.vmem [resolvable:$false] %s4521_s19 }
  0xb9   : > { %vm465_vm6 = vcmp.ge.s32.totalorder %v457_v21, 1  ;;  %v604_v8 = vsel %vm572_vm1, %v599_v3, %v603_v4  ;;  %v4041_v21 = vld [vmem:[#allocation7 + $0x184] ss:$8 sps:$4 sm:$0xff]   ;;  %v4066_v14 = vld [vmem:[#allocation7 + $0x210] ss:$8 sps:$4 sm:$0xff]   ;;  %p4519_p5 = pnand %p4518_p3, %p4827_p10  ;;  %s4523_s24 = scalar_lea.vmem %s4522_s19, 4096 }
  0xba   : > { %vm5012_vm7 = vmpackc.low %vm4602_vm2, %vm465_vm6  ;;  %v4065_v4 = vld [vmem:[#allocation7 + $0x204] ss:$8 sps:$4 sm:$0xff]   ;;  %p4524_p12 = scmp.lt.s32.totalorder %s5471_s30, %s4522_s19  ;;  %p4525_p1 = scmp.lt.s32.totalorder %s4523_s24, %s4517_s17 }
  0xbb   : > { %854 = vmatpush1.bf16.msra.mxu0 %v3990_v30  ;;  %v598_v30 = vsel %vm572_vm1, %v593_v19, %v597_v20  ;;  %v4114_v19 = vld [vmem:[#allocation9 + $0x14] ss:$8 sps:$4 sm:$0xff]   ;;  %s5469_s29 = scalar_lea.hbm %s5580_s13, %s3808_s9  ;;  %p4520_p7 = pneg %p4519_p5 }
  0xbc   : > { %855 = vmatprep.subr.bf16.mxu0 %v3991_v31  ;;  %v451_v31 = vadd.s32 48, %v4899_v10  ;;  %p4526_p2 = por %p4525_p1, %p4524_p12 }
  0xbe   : > { %p4527_p13 = pnand %p4526_p2, %p4520_p7 }
  0xbf   : > { %856 = vmatpush1.bf16.msra.mxu0 %v3993_v32  ;;  %v537_v32 = vld [vmem:[#allocation2 + $0x88] sm:$0x7f] }
  0xc0   : > { %857 = vmatprep.subr.bf16.mxu0 %v3994_v33  ;;  %v3489_v33 = vpack.c.bf16 %v588_v24, %v584_v23  ;;  %v4117_v23 = vld [vmem:[#allocation9 + $0x24] ss:$8 sps:$4 sm:$0xff]   ;;  %v4039_v24 = vld [vmem:[#allocation7 + $0x180] ss:$8 sps:$4 sm:$0xff]  }
  0xc3   : > { %858 = vmatpush1.bf16.msra.mxu0 %v3996_v34  ;;  %v4021_v34 = vld [vmem:[#allocation7 + $0x120] ss:$8 sps:$4 sm:$0xff]  }
  0xc4   : > { %859 = vmatprep.subr.bf16.mxu0 %v3997_v35  ;;  %v3492_v35 = vpack.c.bf16 %v598_v30, %v594_v29  ;;  %v4047_v29 = vld [vmem:[#allocation7 + $0x1a4] ss:$8 sps:$4 sm:$0xff]   ;;  %v4120_v30 = vld [vmem:[#allocation9 + $0x34] ss:$8 sps:$4 sm:$0xff]  }
  0xc7   : > { %860 = vmatpush1.bf16.msra.mxu0 %v3999_v38  ;;  %v591_v38 = vrot.slane %v4956_v46, 7 }
  0xc8   : > { %861 = vmatprep.subr.bf16.mxu0 %v4000_v41  ;;  %v595_v41 = vrot.slane %v4959_v47, 7 }
  0xca   : > { %v596_v59 = vsel %vm572_vm1, %v591_v38, %v595_v41  ;;  %v600_v7 = vsel %vm572_vm1, %v595_v41, %v599_v3  ;;  %v4048_v41 = vld [vmem:[#allocation7 + $0x1b0] ss:$8 sps:$4 sm:$0xff]  }
  0xcb   : > { %862 = vmatpush1.bf16.msra.mxu0 %v4002_v44  ;;  %v4026_v44 = vld [vmem:[#allocation7 + $0x134] ss:$8 sps:$4 sm:$0xff]   ;;  %v4060_v3 = vld [vmem:[#allocation7 + $0x1f0] ss:$8 sps:$4 sm:$0xff]  }
  0xcc   : > { %863 = vmatprep.subr.bf16.mxu0 %v4003_v45 }
  0xcf   : > { %864 = vmatpush1.bf16.msra.mxu0 %v4005_v50  ;;  %v459_v50 = vand.u32 15, %v451_v31  ;;  %v4122_v31 = vld [vmem:[#allocation9 + $0x30] ss:$8 sps:$4 sm:$0xff]  }
  0xd0   : > { %865 = vmatprep.subr.bf16.mxu0 %v4006_v51  ;;  %v601_v51 = vrot.slane %v4964_v48, 7 }
  0xd1   : > { %vm467_vm8 = vcmp.ge.s32.totalorder %v459_v50, 1  ;;  %v4128_v50 = vld [vmem:[#allocation9 + $0x50] ss:$8 sps:$4 sm:$0xff]  }
  0xd2   : > { %v602_v60 = vsel %vm572_vm1, %v597_v20, %v601_v51  ;;  %vm5026_vm9 = vmpackc.low %vm4602_vm2, %vm467_vm8  ;;  %v4036_v20 = vld [vmem:[#allocation7 + $0x170] ss:$8 sps:$4 sm:$0xff]  }
  0xd3   : > { %866 = vmatpush1.bf16.msra.mxu0 %v4008_v54  ;;  %v605_v54 = vrot.slane %v537_v32, 7  ;;  %v4123_v32 = vld [vmem:[#allocation9 + $0x44] ss:$8 sps:$4 sm:$0xff]  }
  0xd4   : > { %867 = vmatprep.subr.bf16.mxu0 %v4009_v55  ;;  %v4024_v55 = vld [vmem:[#allocation7 + $0x130] ss:$8 sps:$4 sm:$0xff]  }
  0xd5   : > { %v606_v61 = vsel %vm572_vm1, %v601_v51, %v605_v54  ;;  %v4129_v51 = vld [vmem:[#allocation9 + $0x64] ss:$8 sps:$4 sm:$0xff]   ;;  %v4051_v54 = vld [vmem:[#allocation7 + $0x1c0] ss:$8 sps:$4 sm:$0xff]  }
  0xd7   : > { %868 = vmatpush1.bf16.msra.mxu0 %v4011_v58  ;;  %v592_v58 = vsel %vm572_vm1, %v587_v15, %v591_v38  ;;  %v4113_v15 = vld [vmem:[#allocation9] ss:$8 sps:$4 sm:$0xff]   ;;  %v4126_v38 = vld [vmem:[#allocation9 + $0x54] ss:$8 sps:$4 sm:$0xff]  }
  0xd8   : > { %869 = vmatprep.subr.bf16.mxu0 %v4012_v62  ;;  %v4027_v62 = vld [vmem:[#allocation7 + $0x140] ss:$8 sps:$4 sm:$0xff]   ;;  %v3495_v0 = vpack.c.bf16 %v596_v59, %v592_v58  ;;  %1811 = vmatpush1.bf16.msra.mxu1 %v4113_v15  ;;  %v4054_v58 = vld [vmem:[#allocation7 + $0x1d0] ss:$8 sps:$4 sm:$0xff]   ;;  %v4059_v59 = vld [vmem:[#allocation7 + $0x1e4] ss:$8 sps:$4 sm:$0xff]  }
  0xd9   : > { %1812 = vmatprep.subr.bf16.mxu1 %v4114_v19  ;;  %v4071_v15 = vld [vmem:[#allocation7 + $0x224] ss:$8 sps:$4 sm:$0xff]   ;;  %v4146_v19 = vld [vmem:[#allocation9 + $0xb0] ss:$8 sps:$4 sm:$0xff]  }
  0xdb   : > { %870 = vmatpush1.bf16.msra.mxu0 %v4014_v2  ;;  %v3498_v2 = vpack.c.bf16 %v606_v61, %v602_v60  ;;  %v4134_v60 = vld [vmem:[#allocation9 + $0x70] ss:$8 sps:$4 sm:$0xff]   ;;  %v4135_v61 = vld [vmem:[#allocation9 + $0x84] ss:$8 sps:$4 sm:$0xff]  }
  0xdc   : > { %1072 = vmatprep.subr.bf16.mxu0 %v4017_v5  ;;  %v4030_v5 = vld [vmem:[#allocation7 + $0x150] ss:$8 sps:$4 sm:$0xff]  }
  0xde   : > { %3484 = vmatmul.mubr.msk.bf16.vlgmr.msra.gmra.mrb[0].mxu0 %vm4916_vm3, %v3483_v11  ;;  %v3501_v11 = vpack.c.bf16 %v604_v8, %v600_v7  ;;  %v4063_v7 = vld [vmem:[#allocation7 + $0x200] ss:$8 sps:$4 sm:$0xff]   ;;  %v493_v8 = vpack.c.bf16 %v4924_v27, %v4921_v26  ;;  %v4074_v27 = vld [vmem:[#allocation7 + $0x234] ss:$8 sps:$4 sm:$0xff]  }
  0xdf   : > { %1073 = vmatpush1.bf16.msra.mxu0 %v4015_v9  ;;  %3487 = vmatprep.mubr.msk.bf16.mxu0 %vm4994_vm5, %v3486_v13  ;;  %v4033_v9 = vld [vmem:[#allocation7 + $0x160] ss:$8 sps:$4 sm:$0xff]   ;;  %v494_v13 = vpack.c.bf16 %v4906_v17, %v4903_v16  ;;  %v4044_v16 = vld [vmem:[#allocation7 + $0x194] ss:$8 sps:$4 sm:$0xff]  }
  0xe0   : > { %1074 = vmatprep.subr.bf16.mxu0 %v4020_v12  ;;  %v4038_v12 = vld [vmem:[#allocation7 + $0x174] ss:$8 sps:$4 sm:$0xff]   ;;  %v4119_v17 = vld [vmem:[#allocation9 + $0x20] ss:$8 sps:$4 sm:$0xff]  }
  0xe1   : > { %v4069_v26 = vld [vmem:[#allocation7 + $0x220] ss:$8 sps:$4 sm:$0xff]  }
  0xe3   : > { %1075 = vmatpush1.bf16.msra.mxu0 %v4018_v22  ;;  %v4116_v22 = vld [vmem:[#allocation9 + $0x10] ss:$8 sps:$4 sm:$0xff]  }
  0xe4   : > { %1076 = vmatprep.subr.bf16.mxu0 %v4023_v28  ;;  %1813 = vmatpush1.bf16.msra.mxu1 %v4116_v22  ;;  %v4042_v28 = vld [vmem:[#allocation7 + $0x190] ss:$8 sps:$4 sm:$0xff]   ;;  %v4149_v22 = vld [vmem:[#allocation9 + $0xc0] ss:$8 sps:$4 sm:$0xff]  }
  0xe5   : > { %1814 = vmatprep.subr.bf16.mxu1 %v4117_v23  ;;  %v4150_v23 = vld [vmem:[#allocation9 + $0xd4] ss:$8 sps:$4 sm:$0xff]  }
  0xe6   : > { %3490 = vmatmul.mubr.msk.bf16.gmra.mrb[4].mxu0 %vm4994_vm5, %v3489_v33  ;;  %v4045_v33 = vld [vmem:[#allocation7 + $0x1a0] ss:$8 sps:$4 sm:$0xff]  }
  0xe7   : > { %1077 = vmatpush1.bf16.msra.mxu0 %v4021_v34  ;;  %3493 = vmatprep.mubr.msk.bf16.mxu0 %vm5012_vm7, %v3492_v35  ;;  %v4050_v34 = vld [vmem:[#allocation7 + $0x1b4] ss:$8 sps:$4 sm:$0xff]   ;;  %v4125_v35 = vld [vmem:[#allocation9 + $0x40] ss:$8 sps:$4 sm:$0xff]  }
  0xe8   : > { %1078 = vmatprep.subr.bf16.mxu0 %v4026_v44  ;;  %1815 = vmatpush1.bf16.msra.mxu1 %v4119_v17  ;;  %v4053_v44 = vld [vmem:[#allocation7 + $0x1c4] ss:$8 sps:$4 sm:$0xff]   ;;  %v446_v17 = vadd.s32 8, %v4899_v10 }
  0xe9   : > { %1816 = vmatprep.subr.bf16.mxu1 %v4120_v30  ;;  %v4080_v30 = vld [vmem:[#allocation7 + $0x254] ss:$8 sps:$4 sm:$0xff]  }
  0xeb   : > { %1079 = vmatpush1.bf16.msra.mxu0 %v4024_v55  ;;  %v4056_v55 = vld [vmem:[#allocation7 + $0x1d4] ss:$8 sps:$4 sm:$0xff]  }
  0xec   : > { %1080 = vmatprep.subr.bf16.mxu0 %v4029_v56  ;;  %1817 = vmatpush1.bf16.msra.mxu1 %v4122_v31  ;;  %v4131_v56 = vld [vmem:[#allocation9 + $0x60] ss:$8 sps:$4 sm:$0xff]  }
  0xed   : > { %1818 = vmatprep.subr.bf16.mxu1 %v4123_v32  ;;  %v4351_v32 = vld [vmem:[#allocation2 + $0x28] sm:$0xff] }
  0xee   : > { %3496 = vmatmul.mubr.msk.bf16.gmra.mrb[8].mxu0 %vm5012_vm7, %v3495_v0  ;;  %v4137_v0 = vld [vmem:[#allocation9 + $0x80] ss:$8 sps:$4 sm:$0xff]  }
  0xef   : > { %1081 = vmatpush1.bf16.msra.mxu0 %v4027_v62  ;;  %3499 = vmatprep.mubr.msk.bf16.mxu0 %vm5026_vm9, %v3498_v2  ;;  %v4057_v62 = vld [vmem:[#allocation7 + $0x1e0] ss:$8 sps:$4 sm:$0xff]   ;;  %v4138_v2 = vld [vmem:[#allocation9 + $0x94] ss:$8 sps:$4 sm:$0xff]  }
  0xf0   : > { %1082 = vmatprep.subr.bf16.mxu0 %v4032_v63  ;;  %1819 = vmatpush1.bf16.msra.mxu1 %v4125_v35  ;;  %v4062_v63 = vld [vmem:[#allocation7 + $0x1f4] ss:$8 sps:$4 sm:$0xff]   ;;  %v454_v35 = vand.u32 15, %v446_v17 }
  0xf1   : > { %1820 = vmatprep.subr.bf16.mxu1 %v4126_v38  ;;  %v4078_v38 = vld [vmem:[#allocation7 + $0x250] ss:$8 sps:$4 sm:$0xff]  }
  0xf2   : > { %vm470_vm11 = vcmp.le.s32.totalorder %v454_v35, 14  ;;  %v1162_v35 = vld [vmem:[#allocation2 + $0x98] sm:$0x1] }
  0xf3   : > { %1083 = vmatpush1.bf16.msra.mxu0 %v4030_v5  ;;  %v4140_v5 = vld [vmem:[#allocation9 + $0x90] ss:$8 sps:$4 sm:$0xff]   ;;  %vm5062_vm12 = vmpackc.low %vm470_vm11, %vm4602_vm2 }
  0xf4   : > { %1084 = vmatprep.subr.bf16.mxu0 %v4035_v6  ;;  %1821 = vmatpush1.bf16.msra.mxu1 %v4128_v50  ;;  %v4141_v6 = vld [vmem:[#allocation9 + $0xa4] ss:$8 sps:$4 sm:$0xff]   ;;  %v4081_v50 = vld [vmem:[#allocation7 + $0x260] ss:$8 sps:$4 sm:$0xff]  }
  0xf5   : > { %1822 = vmatprep.subr.bf16.mxu1 %v4129_v51 }
  0xf6   : > { %3502 = vmatmul.mubr.msk.bf16.gmra.mrb[12].mxu0 %vm5026_vm9, %v3501_v11  ;;  %v496_v11 = vpack.c.bf16 %v4935_v37, %v4932_v36  ;;  %v498_v37 = vpack.c.bf16 %v4951_v43, %v4948_v42  ;;  %v4075_v43 = vld [vmem:[#allocation7 + $0x240] ss:$8 sps:$4 sm:$0xff]  }
  0xf7   : > { %1085 = vmatpush1.bf16.msra.mxu0 %v4033_v9  ;;  %1104 = vmatprep.mubr.bf16.mxu0 %v494_v13  ;;  %v4068_v9 = vld [vmem:[#allocation7 + $0x214] ss:$8 sps:$4 sm:$0xff]  }
  0xf8   : > { %1086 = vmatprep.subr.bf16.mxu0 %v4038_v12  ;;  %1823 = vmatpush1.bf16.msra.mxu1 %v4131_v56  ;;  %v4143_v12 = vld [vmem:[#allocation9 + $0xa0] ss:$8 sps:$4 sm:$0xff]   ;;  %v4144_v13 = vld [vmem:[#allocation9 + $0xb4] ss:$8 sps:$4 sm:$0xff]   ;;  %v4084_v56 = vld [vmem:[#allocation7 + $0x270] ss:$8 sps:$4 sm:$0xff]  }
  0xf9   : > { %1824 = vmatprep.subr.bf16.mxu1 %v4132_v57  ;;  %v4089_v57 = vld [vmem:[#allocation7 + $0x284] ss:$8 sps:$4 sm:$0xff]  }
  0xfb   : > { %1087 = vmatpush1.bf16.msra.mxu0 %v4036_v20  ;;  %v4147_v20 = vld [vmem:[#allocation9 + $0xc4] ss:$8 sps:$4 sm:$0xff]  }
  0xfc   : > { %1088 = vmatprep.subr.bf16.mxu0 %v4041_v21  ;;  %1825 = vmatpush1.bf16.msra.mxu1 %v4134_v60  ;;  %v495_v21 = vpack.c.bf16 %v4943_v40, %v4940_v39  ;;  %v497_v40 = vpack.c.bf16 %v4959_v47, %v4956_v46  ;;  %v4083_v47 = vld [vmem:[#allocation7 + $0x264] ss:$8 sps:$4 sm:$0xff]  }
  0xfd   : > { %1826 = vmatprep.subr.bf16.mxu1 %v4135_v61  ;;  %v4095_v60 = vld [vmem:[#allocation7 + $0x2a4] ss:$8 sps:$4 sm:$0xff]   ;;  %v4093_v61 = vld [vmem:[#allocation7 + $0x2a0] ss:$8 sps:$4 sm:$0xff]  }
  0xff   : > { %1089 = vmatpush1.bf16.msra.mxu0 %v4039_v24  ;;  %v4072_v24 = vld [vmem:[#allocation7 + $0x230] ss:$8 sps:$4 sm:$0xff]  }
 0x100   : > { %1090 = vmatprep.subr.bf16.mxu0 %v4044_v16  ;;  %1827 = vmatpush1.bf16.msra.mxu1 %v4137_v0  ;;  %v4077_v16 = vld [vmem:[#allocation7 + $0x244] ss:$8 sps:$4 sm:$0xff]  }
 0x101   : > { %1828 = vmatprep.subr.bf16.mxu1 %v4138_v2  ;;  %v4101_v0 = vld [vmem:[#allocation7 + $0x2c4] ss:$8 sps:$4 sm:$0xff]   ;;  %v4099_v2 = vld [vmem:[#allocation7 + $0x2c0] ss:$8 sps:$4 sm:$0xff]  }
 0x103   : > { %1091 = vmatpush1.bf16.msra.mxu0 %v4042_v28  ;;  %v1146_v28 = vld [vmem:[#allocation2 + $0x18] sm:$0xfe] }
 0x104   : > { %1092 = vmatprep.subr.bf16.mxu0 %v4047_v29  ;;  %1829 = vmatpush1.bf16.msra.mxu1 %v4140_v5  ;;  %v500_v29 = vpack.c.bf16 %v4967_v49, %v4964_v48  ;;  %v1201_v31 = vrot.slane %v1146_v28, 1  ;;  %v4107_v5 = vld [vmem:[#allocation7 + $0x2e4] ss:$8 sps:$4 sm:$0xff]   ;;  %v1212_v28 = vrot.slane %v4956_v46, 1 }
 0x105   : > { %1830 = vmatprep.subr.bf16.mxu1 %v4141_v6  ;;  %v1145_v6 = vld [vmem:[#allocation2 + $0x10] sm:$0xfe] }
 0x107   : > { %1093 = vmatpush1.bf16.msra.mxu0 %v4045_v33  ;;  %v1202_v33 = vrot.slane %v4351_v32, 1 }
 0x108   : > { %1094 = vmatprep.subr.bf16.mxu0 %v4050_v34  ;;  %1831 = vmatpush1.bf16.msra.mxu1 %v4143_v12  ;;  %v1206_v34 = vrot.slane %v4932_v36, 1  ;;  %v4355_v36 = vld [vmem:[#allocation2 + $0x68] sm:$0xff] }
 0x109   : > { %1832 = vmatprep.subr.bf16.mxu1 %v4144_v13  ;;  %v1204_v13 = vrot.slane %v4940_v39, 1 }
 0x10a   : > { %v1207_v49 = vsel %vm1197_vm10, %v1202_v33, %v1206_v34 }
 0x10b   : > { %1095 = vmatpush1.bf16.msra.mxu0 %v4048_v41  ;;  %v1203_v41 = vsel %vm1197_vm10, %v1201_v31, %v1202_v33 }
 0x10c   : > { %1096 = vmatprep.subr.bf16.mxu0 %v4053_v44  ;;  %1833 = vmatpush1.bf16.msra.mxu1 %v4146_v19  ;;  %v499_v44 = vpack.c.bf16 %v4975_v53, %v4972_v52  ;;  %v3568_v51 = vpack.c.bf16 %v1207_v49, %v1203_v41  ;;  %v4087_v53 = vld [vmem:[#allocation7 + $0x280] ss:$8 sps:$4 sm:$0xff]   ;;  %v1220_v49 = vrot.slane %v4972_v52, 1 }
 0x10d   : > { %1834 = vmatprep.subr.bf16.mxu1 %v4147_v20  ;;  %v1214_v20 = vrot.slane %v4948_v42, 1 }
 0x10f   : > { %1097 = vmatpush1.bf16.msra.mxu0 %v4051_v54  ;;  %v4086_v54 = vld [vmem:[#allocation7 + $0x274] ss:$8 sps:$4 sm:$0xff]  }
 0x110   : > { %1098 = vmatprep.subr.bf16.mxu0 %v4056_v55  ;;  %1835 = vmatpush1.bf16.msra.mxu1 %v4149_v22 }
 0x111   : > { %1836 = vmatprep.subr.bf16.mxu1 %v4150_v23  ;;  %v450_v23 = vadd.s32 40, %v4899_v10 }
 0x113   : > { %1099 = vmatpush1.bf16.msra.mxu0 %v4054_v58  ;;  %v4092_v58 = vld [vmem:[#allocation7 + $0x294] ss:$8 sps:$4 sm:$0xff]  }
 0x114   : > { %1100 = vmatprep.subr.bf16.mxu0 %v4059_v59  ;;  %v4090_v59 = vld [vmem:[#allocation7 + $0x290] ss:$8 sps:$4 sm:$0xff]  }
 0x117   : > { %1101 = vmatpush1.bf16.msra.mxu0 %v4057_v62  ;;  %v4098_v62 = vld [vmem:[#allocation7 + $0x2b4] ss:$8 sps:$4 sm:$0xff]  }
 0x118   : > { %1102 = vmatprep.subr.bf16.mxu0 %v4062_v63  ;;  %v4096_v63 = vld [vmem:[#allocation7 + $0x2b0] ss:$8 sps:$4 sm:$0xff]  }
 0x11b   : > { %1103 = vmatpush1.bf16.msra.mxu0 %v4060_v3  ;;  %v4104_v3 = vld [vmem:[#allocation7 + $0x2d4] ss:$8 sps:$4 sm:$0xff]  }
 0x11c   : > { %1465 = vmatprep.subr.bf16.mxu0 %v4065_v4  ;;  %v4102_v4 = vld [vmem:[#allocation7 + $0x2d0] ss:$8 sps:$4 sm:$0xff]  }
 0x11e   : > { %1105 = vmatmul.mubr.bf16.vlgmr.msra.gmra.mrb[0].mxu0 %v493_v8  ;;  %v4105_v8 = vld [vmem:[#allocation7 + $0x2e0] ss:$8 sps:$4 sm:$0xff]  }
 0x11f   : > { %1466 = vmatpush1.bf16.msra.mxu0 %v4063_v7  ;;  %1114 = vmatprep.mubr.bf16.mxu0 %v496_v11  ;;  %v448_v7 = vadd.s32 24, %v4899_v10  ;;  %v4352_v11 = vld [vmem:[#allocation2 + $0x20] sm:$0xff] }
 0x120   : > { %1467 = vmatprep.subr.bf16.mxu0 %v4068_v9  ;;  %v1198_v9 = vrot.slane %v1145_v6, 1  ;;  %v1199_v12 = vrot.slane %v4352_v11, 1  ;;  %v4152_v6 = vld [vmem:[#allocation9 + $0xd0] ss:$8 sps:$4 sm:$0xff]  }
 0x121   : > { %1837 = vmatpush1.bf16.msra.mxu1 %v4152_v6  ;;  %v4158_v11 = vld [vmem:[#allocation9 + $0xf0] ss:$8 sps:$4 sm:$0xff]   ;;  %v4173_v6 = vld [vmem:[#allocation10 + $0x44] ss:$8 sps:$4 sm:$0xff]  }
 0x123   : > { %1468 = vmatpush1.bf16.msra.mxu0 %v4066_v14  ;;  %v4110_v14 = vld [vmem:[#allocation7 + $0x2f4] ss:$8 sps:$4 sm:$0xff]  }
 0x124   : > { %1469 = vmatprep.subr.bf16.mxu0 %v4071_v15  ;;  %v4353_v15 = vld [vmem:[#allocation2 + $0x48] sm:$0xff] }
 0x125   : > { %v1210_v19 = vrot.slane %v4353_v15, 1  ;;  %v5128_v15 = vsub.s32 1, %v4899_v10 }
 0x126   : > { %1115 = vmatmul.mubr.bf16.gmra.mrb[4].mxu0 %v495_v21  ;;  %v1200_v21 = vsel %vm1197_vm10, %v1198_v9, %v1199_v12  ;;  %v4156_v9 = vld [vmem:[#allocation9 + $0xf4] ss:$8 sps:$4 sm:$0xff]  }
 0x127   : > { %1470 = vmatpush1.bf16.msra.mxu0 %v4069_v26  ;;  %1124 = vmatprep.mubr.bf16.mxu0 %v498_v37  ;;  %v456_v26 = vand.u32 15, %v448_v7  ;;  %v1205_v37 = vsel %vm1197_vm10, %v1199_v12, %v1204_v13  ;;  %v1211_v22 = vsel %vm1197_vm10, %v1206_v34, %v1210_v19  ;;  %v1215_v39 = vsel %vm1197_vm10, %v1210_v19, %v1214_v20  ;;  %v4153_v7 = vld [vmem:[#allocation9 + $0xe4] ss:$8 sps:$4 sm:$0xff]  }
 0x128   : > { %1471 = vmatprep.subr.bf16.mxu0 %v4074_v27  ;;  %v4108_v27 = vld [vmem:[#allocation7 + $0x2f0] ss:$8 sps:$4 sm:$0xff]   ;;  %v3574_v42 = vpack.c.bf16 %v1215_v39, %v1211_v22  ;;  %v452_v34 = vadd.s32 56, %v4899_v10  ;;  %1838 = vmatprep.subr.bf16.mxu1 %v4153_v7  ;;  %v4161_v12 = vld [vmem:[#allocation10 + $0x4] ss:$8 sps:$4 sm:$0xff]  }
 0x129   : > { %vm472_vm13 = vcmp.le.s32.totalorder %v456_v26, 14 }
 0x12a   : > { %vm5080_vm14 = vmpackc.low %vm472_vm13, %vm4602_vm2 }
 0x12b   : > { %1472 = vmatpush1.bf16.msra.mxu0 %v4072_v24  ;;  %v3571_v24 = vpack.c.bf16 %v1205_v37, %v1200_v21 }
 0x12c   : > { %1473 = vmatprep.subr.bf16.mxu0 %v4077_v16  ;;  %v4354_v16 = vld [vmem:[#allocation2 + $0x40] sm:$0xff] }
 0x12d   : > { %v1208_v17 = vrot.slane %v4354_v16, 1 }
 0x12e   : > { %1125 = vmatmul.mubr.bf16.gmra.mrb[8].mxu0 %v497_v40 }
 0x12f   : > { %1474 = vmatpush1.bf16.msra.mxu0 %v4075_v43  ;;  %1134 = vmatprep.mubr.bf16.mxu0 %v500_v29  ;;  %v1218_v43 = vrot.slane %v4355_v36, 1  ;;  %v1222_v29 = vrot.slane %v4964_v48, 1  ;;  %v1209_v31 = vsel %vm1197_vm10, %v1204_v13, %v1208_v17  ;;  %v1213_v46 = vsel %vm1197_vm10, %v1208_v17, %v1212_v28 }
 0x130   : > { %1475 = vmatprep.subr.bf16.mxu0 %v4080_v30  ;;  %v458_v30 = vand.u32 15, %v450_v23  ;;  %v3577_v48 = vpack.c.bf16 %v1213_v46, %v1209_v31  ;;  %v5122_v13 = vsub.s32 0, %v4899_v10  ;;  %v4164_v46 = vld [vmem:[#allocation10 + $0x14] ss:$8 sps:$4 sm:$0xff]  }
 0x131   : > { %v1219_v32 = vsel %vm1197_vm10, %v1214_v20, %v1218_v43  ;;  %v1223_v33 = vsel %vm1197_vm10, %v1218_v43, %v1222_v29 }
 0x132   : > { %vm474_vm15 = vcmp.le.s32.totalorder %v458_v30, 14 }
 0x133   : > { %1476 = vmatpush1.bf16.msra.mxu0 %v4078_v38  ;;  %v3580_v38 = vpack.c.bf16 %v1223_v33, %v1219_v32  ;;  %vm5096_vm0 = vmpackc.low %vm474_vm15, %vm4602_vm2 }
 0x134   : > { %1477 = vmatprep.subr.bf16.mxu0 %v4083_v47  ;;  %v4356_v47 = vld [vmem:[#allocation2 + $0x60] sm:$0xff] }
 0x135   : > { %v1216_v41 = vrot.slane %v4356_v47, 1 }
 0x136   : > { %1135 = vmatmul.mubr.bf16.gmra.mrb[12].mxu0 %v499_v44  ;;  %v2942_v44 = vld [vmem:[%s5524_s6] sm:$0x3] }
 0x137   : > { %1478 = vmatpush1.bf16.msra.mxu0 %v4081_v50  ;;  %3569 = vmatprep.mubr.msk.bf16.mxu0 %vm5062_vm12, %v3568_v51  ;;  %v4357_v50 = vld [vmem:[#allocation2 + $0x88] sm:$0xff] }
 0x138   : > { %1479 = vmatprep.subr.bf16.mxu0 %v4086_v54  ;;  %v1226_v51 = vrot.slane %v4357_v50, 1  ;;  %v1230_v54 = vrot.slane %v1162_v35, 1 }
 0x13a   : > { %v1227_v52 = vsel %vm1197_vm10, %v1222_v29, %v1226_v51  ;;  %v4159_v29 = vld [vmem:[#allocation10] ss:$8 sps:$4 sm:$0xff]  }
 0x13b   : > { %1480 = vmatpush1.bf16.msra.mxu0 %v4084_v56  ;;  %v460_v56 = vand.u32 15, %v452_v34 }
 0x13c   : > { %1481 = vmatprep.subr.bf16.mxu0 %v4089_v57  ;;  %v1217_v57 = vsel %vm1197_vm10, %v1212_v28, %v1216_v41 }
 0x13d   : > { %vm476_vm4 = vcmp.le.s32.totalorder %v460_v56, 14 }
 0x13e   : > { %vm5109_vm6 = vmpackc.low %vm476_vm4, %vm4602_vm2 }
 0x13f   : > { %1482 = vmatpush1.bf16.msra.mxu0 %v4087_v53  ;;  %v1221_v53 = vsel %vm1197_vm10, %v1216_v41, %v1220_v49 }
 0x140   : > { %1483 = vmatprep.subr.bf16.mxu0 %v4092_v58  ;;  %v1231_v58 = vsel %vm1197_vm10, %v1226_v51, %v1230_v54 }
 0x143   : > { %1484 = vmatpush1.bf16.msra.mxu0 %v4090_v59  ;;  %v1161_v59 = vld [vmem:[#allocation2 + $0x90] sm:$0x1] }
 0x144   : > { %1485 = vmatprep.subr.bf16.mxu0 %v4095_v60  ;;  %v3583_v60 = vpack.c.bf16 %v1221_v53, %v1217_v57  ;;  %v4165_v53 = vld [vmem:[#allocation10 + $0x20] ss:$8 sps:$4 sm:$0xff]  }
 0x147   : > { %1486 = vmatpush1.bf16.msra.mxu0 %v4093_v61  ;;  %v3586_v61 = vpack.c.bf16 %v1231_v58, %v1227_v52 }
 0x148   : > { %1487 = vmatprep.subr.bf16.mxu0 %v4098_v62  ;;  %v4358_v62 = vld [vmem:[#allocation2 + $0x80] sm:$0xff] }
 0x14b   : > { %1488 = vmatpush1.bf16.msra.mxu0 %v4096_v63  ;;  %v1224_v63 = vrot.slane %v4358_v62, 1 }
 0x14c   : > { %1489 = vmatprep.subr.bf16.mxu0 %v4101_v0  ;;  %v1228_v0 = vrot.slane %v1161_v59, 1  ;;  %v4170_v59 = vld [vmem:[#allocation10 + $0x34] ss:$8 sps:$4 sm:$0xff]  }
 0x14f   : > { %1490 = vmatpush1.bf16.msra.mxu0 %v4099_v2 }
 0x150   : > { %1491 = vmatprep.subr.bf16.mxu0 %v4104_v3  ;;  %v1225_v3 = vsel %vm1197_vm10, %v1220_v49, %v1224_v63  ;;  %v4167_v49 = vld [vmem:[#allocation10 + $0x24] ss:$8 sps:$4 sm:$0xff]  }
 0x153   : > { %1492 = vmatpush1.bf16.msra.mxu0 %v4102_v4  ;;  %v1229_v4 = vsel %vm1197_vm10, %v1224_v63, %v1228_v0 }
 0x154   : > { %1493 = vmatprep.subr.bf16.mxu0 %v4107_v5  ;;  %v3589_v5 = vpack.c.bf16 %v1229_v4, %v1225_v3  ;;  %v4168_v3 = vld [vmem:[#allocation10 + $0x30] ss:$8 sps:$4 sm:$0xff]  }
 0x157   : > { %1494 = vmatpush1.bf16.msra.mxu0 %v4105_v8  ;;  %v4155_v8 = vld [vmem:[#allocation9 + $0xe0] ss:$8 sps:$4 sm:$0xff]  }
 0x158   : > { %1495 = vmatprep.subr.bf16.mxu0 %v4110_v14  ;;  %1839 = vmatpush1.bf16.msra.mxu1 %v4155_v8  ;;  %v1554_v14 = vld [vmem:[%s5520_s2] sm:$0x3] }
 0x159   : > { %1840 = vmatprep.subr.bf16.mxu1 %v4156_v9  ;;  %v5131_v19 = vrot.slane %v1554_v14, %v5122_v13  ;;  %v5134_v20 = vrot.slane %v1554_v14, %v5128_v15  ;;  %v4171_v14 = vld [vmem:[#allocation10 + $0x40] ss:$8 sps:$4 sm:$0xff]  }
 0x15b   : > { %1496 = vmatpush1.bf16.msra.mxu0 %v4108_v27 }
 0x15c   : > { %1841 = vmatpush1.bf16.msra.mxu1 %v4158_v11 }
 0x15d   : > { %2244 = vmatprep.subr.bf16.mxu1 %v4161_v12 }
 0x15e   : > { %3572 = vmatmul.mubr.msk.bf16.vlgmr.msra.gmra.mrb[0].mxu0 %vm5062_vm12, %v3571_v24 }
 0x15f   : > { %3575 = vmatprep.mubr.msk.bf16.mxu0 %vm5080_vm14, %v3574_v42 }
 0x166   : > { %3578 = vmatmul.mubr.msk.bf16.gmra.mrb[4].mxu0 %vm5080_vm14, %v3577_v48 }
 0x167   : > { %3581 = vmatprep.mubr.msk.bf16.mxu0 %vm5096_vm0, %v3580_v38  ;;  %v4162_v38 = vld [vmem:[#allocation10 + $0x10] ss:$8 sps:$4 sm:$0xff]  }
 0x16e   : > { %3584 = vmatmul.mubr.msk.bf16.gmra.mrb[8].mxu0 %vm5096_vm0, %v3583_v60 }
 0x16f   : > { %3587 = vmatprep.mubr.msk.bf16.mxu0 %vm5109_vm6, %v3586_v61 }
 0x176   : > { %3590 = vmatmul.mubr.msk.bf16.gmra.mrb[12].mxu0 %vm5109_vm6, %v3589_v5 }
 0x231   : > { %v1499_v26 = vpop.f32.mrb[0].mxu0 }
 0x232   : > { %v1566_v27 = vadd.f32 %v5131_v19, %v1499_v26  ;;  %v1501_v21 = vpop.f32.mrb[1].mxu0 }
 0x233   : > { %v1567_v37 = vadd.f32 %v5134_v20, %v1501_v21  ;;  %v1503_v22 = vpop.f32.mrb[2].mxu0  ;;  %v4176_v21 = vld [vmem:[#allocation10 + $0x54] ss:$8 sps:$4 sm:$0xff]  }
 0x234   : > { %v1568_v39 = vadd.f32 %v5131_v19, %v1503_v22  ;;  %v1505_v23 = vpop.f32.mrb[3].mxu0  ;;  %v1582_v10 = vmax.f32 %v1566_v27, 0.0 }
 0x235   : > { %v1569_v24 = vadd.f32 %v5134_v20, %v1505_v23  ;;  %v1583_v16 = vmax.f32 %v1567_v37, 0.0 }
 0x236   : > { %v1584_v42 = vmax.f32 %v1568_v39, 0.0 }
 0x237   : > { %v1585_v17 = vmax.f32 %v1569_v24, 0.0 }
 0x238   : > { %v1598_v28 = vpack.c.bf16 %v1584_v42, %v1582_v10  ;;  %v4174_v10 = vld [vmem:[#allocation10 + $0x50] ss:$8 sps:$4 sm:$0xff]  }
 0x239   : > { %v1509_v36 = vpop.f32.mrb[4].mxu0  ;;  %v1599_v43 = vpack.c.bf16 %v1585_v17, %v1583_v16  ;;  %v4179_v17 = vld [vmem:[#allocation10 + $0x64] ss:$8 sps:$4 sm:$0xff]  }
 0x23a   : > { %v1570_v30 = vadd.f32 %v5131_v19, %v1509_v36  ;;  %v1511_v31 = vpop.f32.mrb[5].mxu0 }
 0x23b   : > { %v1571_v32 = vadd.f32 %v5134_v20, %v1511_v31  ;;  %v1513_v33 = vpop.f32.mrb[6].mxu0  ;;  %1842 = vmatprep.mubr.bf16.mxu1 %v1599_v43  ;;  %v4182_v31 = vld [vmem:[#allocation10 + $0x74] ss:$8 sps:$4 sm:$0xff]  }
 0x23c   : > { %v1572_v34 = vadd.f32 %v5131_v19, %v1513_v33  ;;  %v1515_v35 = vpop.f32.mrb[7].mxu0  ;;  %1843 = vmatmul.mubr.bf16.vlgmr.msra.gmra.mrb[0].mxu1 %v1598_v28  ;;  %v1586_v47 = vmax.f32 %v1570_v30, 0.0  ;;  %v4177_v30 = vld [vmem:[#allocation10 + $0x60] ss:$8 sps:$4 sm:$0xff]   ;;  %v4186_v33 = vld [vmem:[#allocation10 + $0x90] ss:$8 sps:$4 sm:$0xff]  }
 0x23d   : > { %v1573_v48 = vadd.f32 %v5134_v20, %v1515_v35  ;;  %2245 = vmatpush1.bf16.msra.mxu1 %v4159_v29  ;;  %v1587_v50 = vmax.f32 %v1571_v32, 0.0  ;;  %v4188_v32 = vld [vmem:[#allocation10 + $0x94] ss:$8 sps:$4 sm:$0xff]   ;;  %v4189_v35 = vld [vmem:[#allocation10 + $0xa0] ss:$8 sps:$4 sm:$0xff]  }
 0x23e   : > { %v1588_v41 = vmax.f32 %v1572_v34, 0.0  ;;  %2246 = vmatprep.subr.bf16.mxu1 %v4164_v46  ;;  %v4183_v46 = vld [vmem:[#allocation10 + $0x80] ss:$8 sps:$4 sm:$0xff]   ;;  %v4191_v34 = vld [vmem:[#allocation10 + $0xa4] ss:$8 sps:$4 sm:$0xff]  }
 0x23f   : > { %v1589_v51 = vmax.f32 %v1573_v48, 0.0  ;;  %v4194_v48 = vld [vmem:[#allocation10 + $0xb4] ss:$8 sps:$4 sm:$0xff]  }
 0x240   : > { %v1600_v54 = vpack.c.bf16 %v1588_v41, %v1586_v47  ;;  %v4197_v47 = vld [vmem:[#allocation10 + $0xc4] ss:$8 sps:$4 sm:$0xff]   ;;  %v4195_v41 = vld [vmem:[#allocation10 + $0xc0] ss:$8 sps:$4 sm:$0xff]  }
 0x241   : > { %v1601_v56 = vpack.c.bf16 %v1589_v51, %v1587_v50  ;;  %v1519_v57 = vpop.f32.mrb[8].mxu0  ;;  %2247 = vmatpush1.bf16.msra.mxu1 %v4162_v38  ;;  %v4192_v38 = vld [vmem:[#allocation10 + $0xb0] ss:$8 sps:$4 sm:$0xff]   ;;  %v4203_v51 = vld [vmem:[#allocation10 + $0xe4] ss:$8 sps:$4 sm:$0xff]  }
 0x242   : > { %v1574_v52 = vadd.f32 %v5131_v19, %v1519_v57  ;;  %v1521_v58 = vpop.f32.mrb[9].mxu0  ;;  %2248 = vmatprep.subr.bf16.mxu1 %v4167_v49  ;;  %v4200_v49 = vld [vmem:[#allocation10 + $0xd4] ss:$8 sps:$4 sm:$0xff]   ;;  %v4198_v50 = vld [vmem:[#allocation10 + $0xd0] ss:$8 sps:$4 sm:$0xff]  }
 0x243   : > { %v1575_v60 = vadd.f32 %v5134_v20, %v1521_v58  ;;  %v1523_v61 = vpop.f32.mrb[10].mxu0  ;;  %1852 = vmatprep.mubr.bf16.mxu1 %v1601_v56  ;;  %v4206_v56 = vld [vmem:[#allocation10 + $0xf4] ss:$8 sps:$4 sm:$0xff]   ;;  %v4204_v57 = vld [vmem:[#allocation10 + $0xf0] ss:$8 sps:$4 sm:$0xff]  }
 0x244   : > { %v1576_v62 = vadd.f32 %v5131_v19, %v1523_v61  ;;  %v1525_v63 = vpop.f32.mrb[11].mxu0  ;;  %1853 = vmatmul.mubr.bf16.gmra.mrb[4].mxu1 %v1600_v54  ;;  %v1590_v4 = vmax.f32 %v1574_v52, 0.0  ;;  %v4201_v54 = vld [vmem:[#allocation10 + $0xe0] ss:$8 sps:$4 sm:$0xff]   ;;  %v1956_v61 = vld [vmem:[#allocation3] sm:$0x80] }
 0x245   : > { %v1577_v0 = vadd.f32 %v5134_v20, %v1525_v63  ;;  %2249 = vmatpush1.bf16.msra.mxu1 %v4165_v53  ;;  %v1591_v7 = vmax.f32 %v1575_v60, 0.0  ;;  %v4209_v53 = vld [vmem:[#allocation10 + $0x104] ss:$8 sps:$4 sm:$0xff]   ;;  %v1638_v52 = vld [vmem:[%s5522_s4] sm:$0x3] }
 0x246   : > { %v1592_v5 = vmax.f32 %v1576_v62, 0.0  ;;  %2250 = vmatprep.subr.bf16.mxu1 %v4170_v59  ;;  %v5156_v58 = vrot.slane %v1638_v52, %v5122_v13  ;;  %v5159_v59 = vrot.slane %v1638_v52, %v5128_v15 }
 0x247   : > { %v1593_v8 = vmax.f32 %v1577_v0, 0.0  ;;  %v1957_v0 = vld [vmem:[#allocation3 + $0x8] sm:$0x80] }
 0x248   : > { %v1602_v9 = vpack.c.bf16 %v1592_v5, %v1590_v4 }
 0x249   : > { %v1603_v11 = vpack.c.bf16 %v1593_v8, %v1591_v7  ;;  %v1529_v12 = vpop.f32.mrb[12].mxu0  ;;  %2251 = vmatpush1.bf16.msra.mxu1 %v4168_v3  ;;  %v1978_v7 = vrot.slane %v1956_v61, 7 }
 0x24a   : > { %v1578_v26 = vadd.f32 %v5131_v19, %v1529_v12  ;;  %v1531_v27 = vpop.f32.mrb[13].mxu0  ;;  %2252 = vmatprep.subr.bf16.mxu1 %v4173_v6 }
 0x24b   : > { %v1579_v37 = vadd.f32 %v5134_v20, %v1531_v27  ;;  %v1533_v22 = vpop.f32.mrb[14].mxu0  ;;  %1862 = vmatprep.mubr.bf16.mxu1 %v1603_v11  ;;  %v1981_v11 = vrot.slane %v1957_v0, 7 }
 0x24c   : > { %v1580_v39 = vadd.f32 %v5131_v19, %v1533_v22  ;;  %v1535_v23 = vpop.f32.mrb[15].mxu0  ;;  %1863 = vmatmul.mubr.bf16.gmra.mrb[8].mxu1 %v1602_v9  ;;  %v1594_v42 = vmax.f32 %v1578_v26, 0.0  ;;  %v4180_v19 = vld [vmem:[#allocation10 + $0x70] ss:$8 sps:$4 sm:$0xff]  }
 0x24d   : > { %v1581_v24 = vadd.f32 %v5134_v20, %v1535_v23  ;;  %2253 = vmatpush1.bf16.msra.mxu1 %v4171_v14  ;;  %v1595_v28 = vmax.f32 %v1579_v37, 0.0  ;;  %v4185_v20 = vld [vmem:[#allocation10 + $0x84] ss:$8 sps:$4 sm:$0xff]  }
 0x24e   : > { %v1596_v16 = vmax.f32 %v1580_v39, 0.0  ;;  %2254 = vmatprep.subr.bf16.mxu1 %v4176_v21 }
 0x24f   : > { %v1597_v36 = vmax.f32 %v1581_v24, 0.0 }
 0x250   : > { %v1604_v43 = vpack.c.bf16 %v1596_v16, %v1594_v42 }
 0x251   : > { %v1605_v29 = vpack.c.bf16 %v1597_v36, %v1595_v28  ;;  %2255 = vmatpush1.bf16.msra.mxu1 %v4174_v10  ;;  %v4207_v28 = vld [vmem:[#allocation10 + $0x100] ss:$8 sps:$4 sm:$0xff]   ;;  %v4212_v36 = vld [vmem:[#allocation10 + $0x114] ss:$8 sps:$4 sm:$0xff]  }
 0x252   : > { %2256 = vmatprep.subr.bf16.mxu1 %v4179_v17 }
 0x253   : > { %1872 = vmatprep.mubr.bf16.mxu1 %v1605_v29 }
 0x254   : > { %1873 = vmatmul.mubr.bf16.gmra.mrb[12].mxu1 %v1604_v43 }
 0x255   : > { %2257 = vmatpush1.bf16.msra.mxu1 %v4177_v30 }
 0x256   : > { %2258 = vmatprep.subr.bf16.mxu1 %v4182_v31 }
 0x259   : > { %2259 = vmatpush1.bf16.msra.mxu1 %v4180_v19 }
 0x25a   : > { %2260 = vmatprep.subr.bf16.mxu1 %v4185_v20 }
 0x25d   : > { %2261 = vmatpush1.bf16.msra.mxu1 %v4183_v46 }
 0x25e   : > { %2262 = vmatprep.subr.bf16.mxu1 %v4188_v32 }
 0x261   : > { %2263 = vmatpush1.bf16.msra.mxu1 %v4186_v33 }
 0x262   : > { %2264 = vmatprep.subr.bf16.mxu1 %v4191_v34 }
 0x265   : > { %2265 = vmatpush1.bf16.msra.mxu1 %v4189_v35 }
 0x266   : > { %2266 = vmatprep.subr.bf16.mxu1 %v4194_v48 }
 0x269   : > { %2267 = vmatpush1.bf16.msra.mxu1 %v4192_v38 }
 0x26a   : > { %2268 = vmatprep.subr.bf16.mxu1 %v4197_v47 }
 0x26d   : > { %2269 = vmatpush1.bf16.msra.mxu1 %v4195_v41 }
 0x26e   : > { %2270 = vmatprep.subr.bf16.mxu1 %v4200_v49  ;;  %v4210_v49 = vld [vmem:[#allocation10 + $0x110] ss:$8 sps:$4 sm:$0xff]  }
 0x271   : > { %2271 = vmatpush1.bf16.msra.mxu1 %v4198_v50 }
 0x272   : > { %2272 = vmatprep.subr.bf16.mxu1 %v4203_v51 }
 0x275   : > { %2273 = vmatpush1.bf16.msra.mxu1 %v4201_v54  ;;  %v4231_v54 = vld [vmem:[#allocation10 + $0x180] ss:$8 sps:$4 sm:$0xff]  }
 0x276   : > { %2274 = vmatprep.subr.bf16.mxu1 %v4206_v56 }
 0x279   : > { %2275 = vmatpush1.bf16.msra.mxu1 %v4204_v57 }
 0x27a   : > { %2477 = vmatprep.subr.bf16.mxu1 %v4209_v53  ;;  %v4215_v53 = vld [vmem:[#allocation10 + $0x124] ss:$8 sps:$4 sm:$0xff]  }
 0x30f   : > { %v1844_v60 = vpop.f32.mrb[0].mxu1 }
 0x310   : > { %v5162_v62 = vadd.f32 %v1844_v60, %v5156_v58  ;;  %v1846_v63 = vpop.f32.mrb[1].mxu1 }
 0x311   : > { %v5165_v3 = vadd.f32 %v1846_v63, %v5159_v59  ;;  %v1848_v4 = vpop.f32.mrb[2].mxu1 }
 0x312   : > { %1883 = vst [vmem:[#allocation3 + $0x10] sm:$0xff] %v5162_v62  ;;  %v5169_v5 = vadd.f32 %v1848_v4, %v5156_v58  ;;  %v1850_v6 = vpop.f32.mrb[3].mxu1  ;;  %v1979_v8 = vrot.slane %v5162_v62, 7 }
 0x313   : > { %1884 = vst [vmem:[#allocation3 + $0x18] sm:$0xff] %v5165_v3  ;;  %v5174_v9 = vadd.f32 %v1850_v6, %v5159_v59  ;;  %v1982_v12 = vrot.slane %v5165_v3, 7 }
 0x314   : > { %v1984_v14 = vrot.slane %v5169_v5, 7  ;;  %v1915_v26 = vpack.c.bf16 %v5169_v5, %v5162_v62  ;;  %v1980_v37 = vsel %vm572_vm1, %v1978_v7, %v1979_v8  ;;  %v2587_v19 = vrot.slane %v5169_v5, 1  ;;  %v4339_v62 = vld [vmem:[#allocation12 + $0xc0] ss:$8 sps:$4 sm:$0xff]  }
 0x315   : > { %v1986_v27 = vrot.slane %v5174_v9, 7  ;;  %v1916_v21 = vpack.c.bf16 %v5174_v9, %v5165_v3  ;;  %v1983_v23 = vsel %vm572_vm1, %v1981_v11, %v1982_v12  ;;  %v2590_v30 = vrot.slane %v5174_v9, 1  ;;  %v4303_v11 = vld [vmem:[#allocation12] ss:$8 sps:$4 sm:$0xff]   ;;  %v4245_v3 = vld [vmem:[#allocation10 + $0x1c4] ss:$8 sps:$4 sm:$0xff]  }
 0x316   : > { %v1985_v22 = vsel %vm572_vm1, %v1979_v8, %v1984_v14  ;;  %v4318_v9 = vld [vmem:[#allocation12 + $0x50] ss:$8 sps:$4 sm:$0xff]  }
 0x317   : > { %v1854_v39 = vpop.f32.mrb[4].mxu1  ;;  %v1987_v24 = vsel %vm572_vm1, %v1982_v12, %v1986_v27  ;;  %v3659_v10 = vpack.c.bf16 %v1985_v22, %v1980_v37  ;;  %v4213_v22 = vld [vmem:[#allocation10 + $0x120] ss:$8 sps:$4 sm:$0xff]  }
 0x318   : > { %v5188_v42 = vadd.f32 %v1854_v39, %v5156_v58  ;;  %v1856_v16 = vpop.f32.mrb[5].mxu1  ;;  %v3656_v17 = vpack.c.bf16 %v1987_v24, %v1983_v23 }
 0x319   : > { %v5191_v43 = vadd.f32 %v1856_v16, %v5159_v59  ;;  %v1858_v29 = vpop.f32.mrb[6].mxu1  ;;  %v2550_v31 = vld [vmem:[#allocation3 + $0x10] sm:$0xfe] }
 0x31a   : > { %v5196_v20 = vadd.f32 %v1858_v29, %v5156_v58  ;;  %v1860_v46 = vpop.f32.mrb[7].mxu1  ;;  %3657 = vmatprep.mubr.msk.bf16.mxu1 %vm4916_vm3, %v3656_v17  ;;  %v1988_v32 = vrot.slane %v5188_v42, 7  ;;  %v2551_v33 = vld [vmem:[#allocation3 + $0x18] sm:$0xfe]  ;;  %v2586_v34 = vrot.slane %v2550_v31, 1  ;;  %v2592_v35 = vrot.slane %v5188_v42, 1 }
 0x31b   : > { %v5203_v48 = vadd.f32 %v1860_v46, %v5159_v59  ;;  %3660 = vmatmul.mubr.msk.bf16.vlgmr.msra.gmra.mrb[16].mxu1 %vm4916_vm3, %v3659_v10  ;;  %v1990_v38 = vrot.slane %v5191_v43, 7  ;;  %v2589_v47 = vrot.slane %v2551_v33, 1  ;;  %v2594_v41 = vrot.slane %v5191_v43, 1  ;;  %v4218_v16 = vld [vmem:[#allocation10 + $0x134] ss:$8 sps:$4 sm:$0xff]  }
 0x31c   : > { %2478 = vmatpush1.bf16.msra.mxu1 %v4207_v28  ;;  %v1989_v50 = vsel %vm572_vm1, %v1984_v14, %v1988_v32  ;;  %v1992_v51 = vrot.slane %v5196_v20, 7  ;;  %v5214_v56 = vsel %vm1197_vm10, %v2586_v34, %v2587_v19  ;;  %v5228_v0 = vsel %vm1197_vm10, %v2587_v19, %v2592_v35 }
 0x31d   : > { %2479 = vmatprep.subr.bf16.mxu1 %v4212_v36  ;;  %v1991_v25 = vsel %vm572_vm1, %v1986_v27, %v1990_v38  ;;  %v1994_v57 = vrot.slane %v5203_v48, 7  ;;  %v1918_v52 = vpack.c.bf16 %v5203_v48, %v5191_v43  ;;  %v5221_v60 = vsel %vm1197_vm10, %v2589_v47, %v2590_v30 }
 0x31e   : > { %v1993_v61 = vsel %vm572_vm1, %v1988_v32, %v1992_v51  ;;  %v5225_v63 = vsel %vm1197_vm10, %v2590_v30, %v2594_v41  ;;  %v2598_v4 = vrot.slane %v5203_v48, 1  ;;  %v2596_v23 = vrot.slane %v5196_v20, 1  ;;  %v4216_v32 = vld [vmem:[#allocation10 + $0x130] ss:$8 sps:$4 sm:$0xff]  }
 0x31f   : > { %v1864_v6 = vpop.f32.mrb[8].mxu1  ;;  %v1995_v7 = vsel %vm572_vm1, %v1990_v38, %v1994_v57  ;;  %v3665_v8 = vpack.c.bf16 %v1993_v61, %v1989_v50  ;;  %v5567_v5 = vpack.c.bf16 %v5196_v20, %v5188_v42  ;;  %v4264_v48 = vld [vmem:[#allocation10 + $0x230] ss:$8 sps:$4 sm:$0xff]  }
 0x320   : > { %v5237_v14 = vadd.f32 %v1864_v6, %v5156_v58  ;;  %v1866_v27 = vpop.f32.mrb[9].mxu1  ;;  %2480 = vmatpush1.bf16.msra.mxu1 %v4210_v49  ;;  %v3662_v37 = vpack.c.bf16 %v1995_v7, %v1991_v25  ;;  %v5240_v39 = vsel %vm1197_vm10, %v2594_v41, %v2598_v4  ;;  %v5253_v29 = vsel %vm1197_vm10, %v2592_v35, %v2596_v23  ;;  %v4221_v41 = vld [vmem:[#allocation10 + $0x144] ss:$8 sps:$4 sm:$0xff]  }
 0x321   : > { %v5244_v24 = vadd.f32 %v1866_v27, %v5159_v59  ;;  %v1868_v10 = vpop.f32.mrb[10].mxu1  ;;  %2481 = vmatprep.subr.bf16.mxu1 %v4215_v53  ;;  %v2566_v27 = vld [vmem:[#allocation3 + $0x90] sm:$0x1] }
 0x322   : > { %v5247_v17 = vadd.f32 %v1868_v10, %v5156_v58  ;;  %v1870_v28 = vpop.f32.mrb[11].mxu1  ;;  %3663 = vmatprep.mubr.msk.bf16.mxu1 %vm4994_vm5, %v3662_v37  ;;  %v1996_v36 = vrot.slane %v5237_v14, 7  ;;  %v2600_v30 = vrot.slane %v5237_v14, 1 }
 0x323   : > { %v5257_v31 = vadd.f32 %v1870_v28, %v5159_v59  ;;  %3666 = vmatmul.mubr.msk.bf16.gmra.mrb[20].mxu1 %vm4994_vm5, %v3665_v8  ;;  %v1998_v19 = vrot.slane %v5244_v24, 7  ;;  %v2602_v46 = vrot.slane %v5244_v24, 1 }
 0x324   : > { %2482 = vmatpush1.bf16.msra.mxu1 %v4213_v22  ;;  %v1997_v33 = vsel %vm572_vm1, %v1992_v51, %v1996_v36  ;;  %v2000_v34 = vrot.slane %v5247_v17, 7  ;;  %v5268_v38 = vsel %vm1197_vm10, %v2596_v23, %v2600_v30  ;;  %v2604_v8 = vrot.slane %v5247_v17, 1  ;;  %v4219_v23 = vld [vmem:[#allocation10 + $0x140] ss:$8 sps:$4 sm:$0xff]  }
 0x325   : > { %2483 = vmatprep.subr.bf16.mxu1 %v4218_v16  ;;  %v1999_v18 = vsel %vm572_vm1, %v1994_v57, %v1998_v19  ;;  %v2002_v47 = vrot.slane %v5257_v31, 7  ;;  %v5275_v50 = vsel %vm1197_vm10, %v2598_v4, %v2602_v46  ;;  %v2606_v61 = vrot.slane %v5257_v31, 1  ;;  %v2567_v16 = vld [vmem:[#allocation3 + $0x98] sm:$0x1] }
 0x326   : > { %v2001_v51 = vsel %vm572_vm1, %v1996_v36, %v2000_v34  ;;  %v5568_v43 = vpack.c.bf16 %v5257_v31, %v5244_v24  ;;  %v5569_v42 = vpack.c.bf16 %v5247_v17, %v5237_v14  ;;  %v4270_v24 = vld [vmem:[#allocation10 + $0x250] ss:$8 sps:$4 sm:$0xff]   ;;  %v4275_v31 = vld [vmem:[#allocation10 + $0x264] ss:$8 sps:$4 sm:$0xff]   ;;  %v5572_v14 = vpack.c.bf16 %v5225_v63, %v5221_v60 }
 0x327   : > { %v1874_v57 = vpop.f32.mrb[12].mxu1  ;;  %v2003_v6 = vsel %vm572_vm1, %v1998_v19, %v2002_v47  ;;  %v3671_v7 = vpack.c.bf16 %v2001_v51, %v1997_v33  ;;  %v5289_v10 = vsel %vm1197_vm10, %v2602_v46, %v2606_v61  ;;  %v4224_v19 = vld [vmem:[#allocation10 + $0x154] ss:$8 sps:$4 sm:$0xff]   ;;  %v5295_v33 = vsel %vm1197_vm10, %v2600_v30, %v2604_v8  ;;  %v4276_v17 = vld [vmem:[#allocation10 + $0x270] ss:$8 sps:$4 sm:$0xff]  }
 0x328   : > { %v5286_v4 = vadd.f32 %v1874_v57, %v5156_v58  ;;  %v1876_v37 = vpop.f32.mrb[13].mxu1  ;;  %2484 = vmatpush1.bf16.msra.mxu1 %v4216_v32  ;;  %v3668_v22 = vpack.c.bf16 %v2003_v6, %v1999_v18  ;;  %v2616_v18 = vrot.slane %v2566_v27, 1  ;;  %v4288_v60 = vld [vmem:[#allocation10 + $0x2b0] ss:$8 sps:$4 sm:$0xff]   ;;  %v4293_v63 = vld [vmem:[#allocation10 + $0x2c4] ss:$8 sps:$4 sm:$0xff]  }
 0x329   : > { %v5292_v28 = vadd.f32 %v1876_v37, %v5159_v59  ;;  %v1878_v36 = vpop.f32.mrb[14].mxu1  ;;  %2485 = vmatprep.subr.bf16.mxu1 %v4221_v41  ;;  %v2618_v41 = vrot.slane %v2567_v16, 1  ;;  %v4222_v37 = vld [vmem:[#allocation10 + $0x150] ss:$8 sps:$4 sm:$0xff]   ;;  %v4227_v16 = vld [vmem:[#allocation10 + $0x164] ss:$8 sps:$4 sm:$0xff]  }
 0x32a   : > { %v5298_v51 = vadd.f32 %v1878_v36, %v5156_v58  ;;  %v1880_v57 = vpop.f32.mrb[15].mxu1  ;;  %3669 = vmatprep.mubr.msk.bf16.mxu1 %vm5012_vm7, %v3668_v22  ;;  %v2004_v46 = vrot.slane %v5286_v4, 7  ;;  %v2608_v32 = vrot.slane %v5286_v4, 1 }
 0x32b   : > { %v5305_v6 = vadd.f32 %v1880_v57, %v5159_v59  ;;  %3672 = vmatmul.mubr.msk.bf16.gmra.mrb[24].mxu1 %vm5012_vm7, %v3671_v7  ;;  %v2006_v30 = vrot.slane %v5292_v28, 7  ;;  %v2610_v58 = vrot.slane %v5292_v28, 1 }
 0x32c   : > { %1897 = vst [vmem:[#allocation3 + $0x80] sm:$0xff] %v5298_v51  ;;  %2486 = vmatpush1.bf16.msra.mxu1 %v4219_v23  ;;  %v2005_v22 = vsel %vm572_vm1, %v2000_v34, %v2004_v46  ;;  %v5316_v59 = vsel %vm1197_vm10, %v2604_v8, %v2608_v32  ;;  %v2612_v45 = vrot.slane %v5298_v51, 1  ;;  %v4230_v8 = vld [vmem:[#allocation10 + $0x174] ss:$8 sps:$4 sm:$0xff]   ;;  %v4233_v23 = vld [vmem:[#allocation10 + $0x184] ss:$8 sps:$4 sm:$0xff]  }
 0x32d   : > { %1898 = vst [vmem:[#allocation3 + $0x88] sm:$0xff] %v5305_v6  ;;  %2487 = vmatprep.subr.bf16.mxu1 %v4224_v19  ;;  %v2007_v7 = vsel %vm572_vm1, %v2002_v47, %v2006_v30  ;;  %v5324_v36 = vsel %vm1197_vm10, %v2606_v61, %v2610_v58  ;;  %v2614_v57 = vrot.slane %v5305_v6, 1  ;;  %v4225_v61 = vld [vmem:[#allocation10 + $0x160] ss:$8 sps:$4 sm:$0xff]   ;;  %v4228_v19 = vld [vmem:[#allocation10 + $0x170] ss:$8 sps:$4 sm:$0xff]   ;;  %v5570_v20 = vpack.c.bf16 %v5305_v6, %v5292_v28 }
 0x32e   : > { %v5332_v53 = vsel %vm1197_vm10, %v2608_v32, %v2612_v45  ;;  %v5335_v47 = vsel %vm1197_vm10, %v2612_v45, %v2616_v18  ;;  %v4305_v18 = vld [vmem:[#allocation12 + $0x4] ss:$8 sps:$4 sm:$0xff]   ;;  %v4279_v6 = vld [vmem:[#allocation10 + $0x280] ss:$8 sps:$4 sm:$0xff]   ;;  %v5577_v55 = vpack.c.bf16 %v5316_v59, %v5295_v33 }
 0x32f   : > { %v5340_v25 = vsel %vm1197_vm10, %v2610_v58, %v2614_v57  ;;  %v5343_v34 = vsel %vm1197_vm10, %v2614_v57, %v2618_v41  ;;  %3198 = vmatprep.subr.bf16.mxu0 %v4305_v18  ;;  %v4308_v58 = vld [vmem:[#allocation12 + $0x14] ss:$8 sps:$4 sm:$0xff]   ;;  %v4311_v32 = vld [vmem:[#allocation12 + $0x24] ss:$8 sps:$4 sm:$0xff]   ;;  %v4246_v18 = vld [vmem:[#allocation10 + $0x1d0] ss:$8 sps:$4 sm:$0xff]   ;;  %v5579_v40 = vpack.c.bf16 %v5335_v47, %v5332_v53 }
 0x330   : > { %2488 = vmatpush1.bf16.msra.mxu1 %v4222_v37  ;;  %3199 = vmatpush1.bf16.msra.mxu0 %v4303_v11  ;;  %v4314_v11 = vld [vmem:[#allocation12 + $0x34] ss:$8 sps:$4 sm:$0xff]   ;;  %v4281_v28 = vld [vmem:[#allocation10 + $0x284] ss:$8 sps:$4 sm:$0xff]  }
 0x331   : > { %2489 = vmatprep.subr.bf16.mxu1 %v4227_v16  ;;  %v4306_v16 = vld [vmem:[#allocation12 + $0x10] ss:$8 sps:$4 sm:$0xff]   ;;  %3200 = vmatprep.subr.bf16.mxu0 %v4308_v58  ;;  %v4329_v58 = vld [vmem:[#allocation12 + $0x84] ss:$8 sps:$4 sm:$0xff]  }
 0x333   : > { %v1958_v12 = vld [vmem:[#allocation3 + $0x80] sm:$0x7f] }
 0x334   : > { %v1959_v45 = vld [vmem:[#allocation3 + $0x88] sm:$0x7f]  ;;  %v2008_v27 = vrot.slane %v1958_v12, 7  ;;  %2490 = vmatpush1.bf16.msra.mxu1 %v4225_v61  ;;  %v4236_v12 = vld [vmem:[#allocation10 + $0x194] ss:$8 sps:$4 sm:$0xff]   ;;  %3201 = vmatpush1.bf16.msra.mxu0 %v4306_v16 }
 0x335   : > { %v2010_v37 = vrot.slane %v1959_v45, 7  ;;  %2491 = vmatprep.subr.bf16.mxu1 %v4230_v8  ;;  %v4309_v8 = vld [vmem:[#allocation12 + $0x20] ss:$8 sps:$4 sm:$0xff]   ;;  %3202 = vmatprep.subr.bf16.mxu0 %v4311_v32  ;;  %v4326_v32 = vld [vmem:[#allocation12 + $0x74] ss:$8 sps:$4 sm:$0xff]  }
 0x336   : > { %v2009_v41 = vsel %vm572_vm1, %v2004_v46, %v2008_v27  ;;  %v4234_v46 = vld [vmem:[#allocation10 + $0x190] ss:$8 sps:$4 sm:$0xff]   ;;  %v4317_v27 = vld [vmem:[#allocation12 + $0x44] ss:$8 sps:$4 sm:$0xff]   ;;  %v4321_v61 = vld [vmem:[#allocation12 + $0x60] ss:$8 sps:$4 sm:$0xff]  }
 0x337   : > { %v2011_v57 = vsel %vm572_vm1, %v2006_v30, %v2010_v37  ;;  %v3677_v35 = vpack.c.bf16 %v2009_v41, %v2005_v22  ;;  %v4239_v30 = vld [vmem:[#allocation10 + $0x1a4] ss:$8 sps:$4 sm:$0xff]   ;;  %v4312_v22 = vld [vmem:[#allocation12 + $0x30] ss:$8 sps:$4 sm:$0xff]   ;;  %v4249_v41 = vld [vmem:[#allocation10 + $0x1e0] ss:$8 sps:$4 sm:$0xff]  }
 0x338   : > { %v3674_v49 = vpack.c.bf16 %v2011_v57, %v2007_v7  ;;  %2492 = vmatpush1.bf16.msra.mxu1 %v4228_v19  ;;  %3203 = vmatpush1.bf16.msra.mxu0 %v4309_v8  ;;  %v4242_v7 = vld [vmem:[#allocation10 + $0x1b4] ss:$8 sps:$4 sm:$0xff]   ;;  %v4251_v45 = vld [vmem:[#allocation10 + $0x1e4] ss:$8 sps:$4 sm:$0xff]   ;;  %v4324_v37 = vld [vmem:[#allocation12 + $0x70] ss:$8 sps:$4 sm:$0xff]  }
 0x339   : > { %2493 = vmatprep.subr.bf16.mxu1 %v4233_v23  ;;  %3204 = vmatprep.subr.bf16.mxu0 %v4314_v11  ;;  %v4240_v23 = vld [vmem:[#allocation10 + $0x1b0] ss:$8 sps:$4 sm:$0xff]   ;;  %v4248_v19 = vld [vmem:[#allocation10 + $0x1d4] ss:$8 sps:$4 sm:$0xff]   ;;  %v4327_v57 = vld [vmem:[#allocation12 + $0x80] ss:$8 sps:$4 sm:$0xff]  }
 0x33a   : > { %3675 = vmatprep.mubr.msk.bf16.mxu1 %vm5026_vm9, %v3674_v49  ;;  %v4237_v49 = vld [vmem:[#allocation10 + $0x1a0] ss:$8 sps:$4 sm:$0xff]   ;;  %v4254_v16 = vld [vmem:[#allocation10 + $0x1f4] ss:$8 sps:$4 sm:$0xff]   ;;  %v4252_v8 = vld [vmem:[#allocation10 + $0x1f0] ss:$8 sps:$4 sm:$0xff]  }
 0x33b   : > { %3678 = vmatmul.mubr.msk.bf16.gmra.mrb[28].mxu1 %vm5026_vm9, %v3677_v35  ;;  %v4320_v35 = vld [vmem:[#allocation12 + $0x54] ss:$8 sps:$4 sm:$0xff]   ;;  %v4257_v11 = vld [vmem:[#allocation10 + $0x204] ss:$8 sps:$4 sm:$0xff]  }
 0x33c   : > { %2509 = vmatprep.mubr.bf16.mxu1 %v1916_v21  ;;  %2494 = vmatpush1.bf16.msra.mxu1 %v4231_v54  ;;  %v4323_v21 = vld [vmem:[#allocation12 + $0x64] ss:$8 sps:$4 sm:$0xff]   ;;  %v4243_v54 = vld [vmem:[#allocation10 + $0x1c0] ss:$8 sps:$4 sm:$0xff]  }
 0x33d   : > { %2495 = vmatprep.subr.bf16.mxu1 %v4236_v12  ;;  %3205 = vmatpush1.bf16.msra.mxu0 %v4312_v22  ;;  %v4332_v12 = vld [vmem:[#allocation12 + $0x94] ss:$8 sps:$4 sm:$0xff]   ;;  %v4255_v22 = vld [vmem:[#allocation10 + $0x200] ss:$8 sps:$4 sm:$0xff]  }
 0x33e   : > { %3206 = vmatprep.subr.bf16.mxu0 %v4317_v27  ;;  %v4260_v27 = vld [vmem:[#allocation10 + $0x214] ss:$8 sps:$4 sm:$0xff]  }
 0x340   : > { %2496 = vmatpush1.bf16.msra.mxu1 %v4234_v46  ;;  %v4330_v46 = vld [vmem:[#allocation12 + $0x90] ss:$8 sps:$4 sm:$0xff]  }
 0x341   : > { %2497 = vmatprep.subr.bf16.mxu1 %v4239_v30  ;;  %3207 = vmatpush1.bf16.msra.mxu0 %v4315_v1  ;;  %v4335_v30 = vld [vmem:[#allocation12 + $0xa4] ss:$8 sps:$4 sm:$0xff]   ;;  %v4258_v1 = vld [vmem:[#allocation10 + $0x210] ss:$8 sps:$4 sm:$0xff]  }
 0x342   : > { %3208 = vmatprep.subr.bf16.mxu0 %v4320_v35  ;;  %v4263_v35 = vld [vmem:[#allocation10 + $0x224] ss:$8 sps:$4 sm:$0xff]  }
 0x344   : > { %2498 = vmatpush1.bf16.msra.mxu1 %v4237_v49  ;;  %v4333_v49 = vld [vmem:[#allocation12 + $0xa0] ss:$8 sps:$4 sm:$0xff]  }
 0x345   : > { %2499 = vmatprep.subr.bf16.mxu1 %v4242_v7  ;;  %3209 = vmatpush1.bf16.msra.mxu0 %v4318_v9  ;;  %v4338_v7 = vld [vmem:[#allocation12 + $0xb4] ss:$8 sps:$4 sm:$0xff]   ;;  %v4261_v9 = vld [vmem:[#allocation10 + $0x220] ss:$8 sps:$4 sm:$0xff]  }
 0x346   : > { %3210 = vmatprep.subr.bf16.mxu0 %v4323_v21  ;;  %v4266_v21 = vld [vmem:[#allocation10 + $0x234] ss:$8 sps:$4 sm:$0xff]  }
 0x348   : > { %2500 = vmatpush1.bf16.msra.mxu1 %v4240_v23  ;;  %v4336_v23 = vld [vmem:[#allocation12 + $0xb0] ss:$8 sps:$4 sm:$0xff]  }
 0x349   : > { %2501 = vmatprep.subr.bf16.mxu1 %v4245_v3  ;;  %3211 = vmatpush1.bf16.msra.mxu0 %v4321_v61  ;;  %v4341_v3 = vld [vmem:[#allocation12 + $0xc4] ss:$8 sps:$4 sm:$0xff]   ;;  %v4272_v61 = vld [vmem:[#allocation10 + $0x254] ss:$8 sps:$4 sm:$0xff]  }
 0x34a   : > { %3212 = vmatprep.subr.bf16.mxu0 %v4326_v32  ;;  %v4273_v32 = vld [vmem:[#allocation10 + $0x260] ss:$8 sps:$4 sm:$0xff]  }
 0x34c   : > { %2502 = vmatpush1.bf16.msra.mxu1 %v4243_v54  ;;  %v4342_v54 = vld [vmem:[#allocation12 + $0xd0] ss:$8 sps:$4 sm:$0xff]  }
 0x34d   : > { %2503 = vmatprep.subr.bf16.mxu1 %v4248_v19  ;;  %3213 = vmatpush1.bf16.msra.mxu0 %v4324_v37  ;;  %v4267_v19 = vld [vmem:[#allocation10 + $0x240] ss:$8 sps:$4 sm:$0xff]   ;;  %v4284_v37 = vld [vmem:[#allocation10 + $0x294] ss:$8 sps:$4 sm:$0xff]  }
 0x34e   : > { %3214 = vmatprep.subr.bf16.mxu0 %v4329_v58  ;;  %v4282_v58 = vld [vmem:[#allocation10 + $0x290] ss:$8 sps:$4 sm:$0xff]  }
 0x350   : > { %2504 = vmatpush1.bf16.msra.mxu1 %v4246_v18  ;;  %v4278_v18 = vld [vmem:[#allocation10 + $0x274] ss:$8 sps:$4 sm:$0xff]  }
 0x351   : > { %2505 = vmatprep.subr.bf16.mxu1 %v4251_v45  ;;  %3215 = vmatpush1.bf16.msra.mxu0 %v4327_v57  ;;  %v5571_v45 = vpack.c.bf16 %v5298_v51, %v5286_v4  ;;  %v4285_v4 = vld [vmem:[#allocation10 + $0x2a0] ss:$8 sps:$4 sm:$0xff]   ;;  %v4290_v51 = vld [vmem:[#allocation10 + $0x2b4] ss:$8 sps:$4 sm:$0xff]  }
 0x352   : > { %3216 = vmatprep.subr.bf16.mxu0 %v4332_v12  ;;  %v4296_v57 = vld [vmem:[#allocation10 + $0x2d4] ss:$8 sps:$4 sm:$0xff]   ;;  %v4294_v12 = vld [vmem:[#allocation10 + $0x2d0] ss:$8 sps:$4 sm:$0xff]  }
 0x354   : > { %2506 = vmatpush1.bf16.msra.mxu1 %v4249_v41  ;;  %v4287_v41 = vld [vmem:[#allocation10 + $0x2a4] ss:$8 sps:$4 sm:$0xff]  }
 0x355   : > { %2507 = vmatprep.subr.bf16.mxu1 %v4254_v16  ;;  %3217 = vmatpush1.bf16.msra.mxu0 %v4330_v46  ;;  %v4291_v16 = vld [vmem:[#allocation10 + $0x2c0] ss:$8 sps:$4 sm:$0xff]   ;;  %v4302_v46 = vld [vmem:[#allocation10 + $0x2f4] ss:$8 sps:$4 sm:$0xff]  }
 0x356   : > { %3218 = vmatprep.subr.bf16.mxu0 %v4335_v30  ;;  %v4300_v30 = vld [vmem:[#allocation10 + $0x2f0] ss:$8 sps:$4 sm:$0xff]  }
 0x358   : > { %2508 = vmatpush1.bf16.msra.mxu1 %v4252_v8  ;;  %v4299_v8 = vld [vmem:[#allocation10 + $0x2e4] ss:$8 sps:$4 sm:$0xff]  }
 0x359   : > { %2853 = vmatprep.subr.bf16.mxu1 %v4257_v11  ;;  %3219 = vmatpush1.bf16.msra.mxu0 %v4333_v49  ;;  %v4297_v11 = vld [vmem:[#allocation10 + $0x2e0] ss:$8 sps:$4 sm:$0xff]   ;;  %v5575_v49 = vpack.c.bf16 %v5268_v38, %v5253_v29  ;;  %v4348_v29 = vld [vmem:[#allocation12 + $0xf0] ss:$8 sps:$4 sm:$0xff]   ;;  %v4350_v38 = vld [vmem:[#allocation12 + $0xf4] ss:$8 sps:$4 sm:$0xff]  }
 0x35a   : > { %3220 = vmatprep.subr.bf16.mxu0 %v4338_v7  ;;  %v5576_v7 = vpack.c.bf16 %v5324_v36, %v5289_v10 }
 0x35b   : > { %2510 = vmatmul.mubr.bf16.vlgmr.msra.gmra.mrb[16].mxu1 %v1915_v26  ;;  %v4344_v26 = vld [vmem:[#allocation12 + $0xd4] ss:$8 sps:$4 sm:$0xff]  }
 0x35c   : > { %2519 = vmatprep.mubr.bf16.mxu1 %v1918_v52  ;;  %2854 = vmatpush1.bf16.msra.mxu1 %v4255_v22  ;;  %v4269_v52 = vld [vmem:[#allocation10 + $0x244] ss:$8 sps:$4 sm:$0xff]   ;;  %v5573_v22 = vpack.c.bf16 %v5228_v0, %v5214_v56  ;;  %v5578_v56 = vpack.c.bf16 %v5343_v34, %v5340_v25  ;;  %v2951_v25 = vrot.slane %v2942_v44, %v5128_v15 }
 0x35d   : > { %2855 = vmatprep.subr.bf16.mxu1 %v4260_v27  ;;  %3221 = vmatpush1.bf16.msra.mxu0 %v4336_v23  ;;  %v5574_v27 = vpack.c.bf16 %v5275_v50, %v5240_v39  ;;  %v4347_v0 = vld [vmem:[#allocation12 + $0xe4] ss:$8 sps:$4 sm:$0xff]   ;;  %v4345_v39 = vld [vmem:[#allocation12 + $0xe0] ss:$8 sps:$4 sm:$0xff]   ;;  %v2947_v50 = vrot.slane %v2942_v44, %v5122_v13 }
 0x35e   : > { %3222 = vmatprep.subr.bf16.mxu0 %v4341_v3 }
 0x360   : > { %2856 = vmatpush1.bf16.msra.mxu1 %v4258_v1 }
 0x361   : > { %2857 = vmatprep.subr.bf16.mxu1 %v4263_v35  ;;  %3223 = vmatpush1.bf16.msra.mxu0 %v4339_v62 }
 0x362   : > { %3224 = vmatprep.subr.bf16.mxu0 %v4344_v26 }
 0x363   : > { %2520 = vmatmul.mubr.bf16.gmra.mrb[20].mxu1 %v5567_v5 }
 0x364   : > { %2529 = vmatprep.mubr.bf16.mxu1 %v5568_v43  ;;  %2858 = vmatpush1.bf16.msra.mxu1 %v4261_v9 }
 0x365   : > { %2859 = vmatprep.subr.bf16.mxu1 %v4266_v21  ;;  %3225 = vmatpush1.bf16.msra.mxu0 %v4342_v54 }
 0x366   : > { %3226 = vmatprep.subr.bf16.mxu0 %v4347_v0 }
 0x368   : > { %2860 = vmatpush1.bf16.msra.mxu1 %v4264_v48 }
 0x369   : > { %2861 = vmatprep.subr.bf16.mxu1 %v4269_v52  ;;  %3227 = vmatpush1.bf16.msra.mxu0 %v4345_v39  ;;  %v3026_v39 = vld [vmem:[%s5526_s8] sm:$0x3] }
 0x36a   : > { %3228 = vmatprep.subr.bf16.mxu0 %v4350_v38  ;;  %v5429_v38 = vrot.slane %v3026_v39, %v5128_v15  ;;  %v4361_v15 = vld [vmem:[#allocation2 + $0x20] sm:$0xff] }
 0x36b   : > { %2530 = vmatmul.mubr.bf16.gmra.mrb[24].mxu1 %v5569_v42 }
 0x36c   : > { %2539 = vmatprep.mubr.bf16.mxu1 %v5570_v20  ;;  %2862 = vmatpush1.bf16.msra.mxu1 %v4267_v19 }
 0x36d   : > { %2863 = vmatprep.subr.bf16.mxu1 %v4272_v61  ;;  %3229 = vmatpush1.bf16.msra.mxu0 %v4348_v29  ;;  %v5426_v29 = vrot.slane %v3026_v39, %v5122_v13 }
 0x370   : > { %2864 = vmatpush1.bf16.msra.mxu1 %v4270_v24 }
 0x371   : > { %2865 = vmatprep.subr.bf16.mxu1 %v4275_v31 }
 0x373   : > { %2540 = vmatmul.mubr.bf16.gmra.mrb[28].mxu1 %v5571_v45 }
 0x374   : > { %2866 = vmatpush1.bf16.msra.mxu1 %v4273_v32  ;;  %3745 = vmatprep.mubr.msk.bf16.mxu1 %vm5062_vm12, %v5572_v14 }
 0x375   : > { %2867 = vmatprep.subr.bf16.mxu1 %v4278_v18 }
 0x378   : > { %2868 = vmatpush1.bf16.msra.mxu1 %v4276_v17 }
 0x379   : > { %2869 = vmatprep.subr.bf16.mxu1 %v4281_v28 }
 0x37c   : > { %2870 = vmatpush1.bf16.msra.mxu1 %v4279_v6 }
 0x37d   : > { %2871 = vmatprep.subr.bf16.mxu1 %v4284_v37 }
 0x380   : > { %2872 = vmatpush1.bf16.msra.mxu1 %v4282_v58 }
 0x381   : > { %2873 = vmatprep.subr.bf16.mxu1 %v4287_v41 }
 0x384   : > { %2874 = vmatpush1.bf16.msra.mxu1 %v4285_v4 }
 0x385   : > { %2875 = vmatprep.subr.bf16.mxu1 %v4290_v51 }
 0x388   : > { %2876 = vmatpush1.bf16.msra.mxu1 %v4288_v60 }
 0x389   : > { %2877 = vmatprep.subr.bf16.mxu1 %v4293_v63 }
 0x38c   : > { %2878 = vmatpush1.bf16.msra.mxu1 %v4291_v16 }
 0x38d   : > { %2879 = vmatprep.subr.bf16.mxu1 %v4296_v57 }
 0x390   : > { %2880 = vmatpush1.bf16.msra.mxu1 %v4294_v12 }
 0x391   : > { %2881 = vmatprep.subr.bf16.mxu1 %v4299_v8 }
 0x394   : > { %2882 = vmatpush1.bf16.msra.mxu1 %v4297_v11 }
 0x395   : > { %2883 = vmatprep.subr.bf16.mxu1 %v4302_v46 }
 0x398   : > { %2884 = vmatpush1.bf16.msra.mxu1 %v4300_v30 }
 0x39b   : > { %3748 = vmatmul.mubr.msk.bf16.vlgmr.msra.gmra.mrb[16].mxu1 %vm5062_vm12, %v5573_v22 }
 0x39c   : > { %3751 = vmatprep.mubr.msk.bf16.mxu1 %vm5080_vm14, %v5574_v27 }
 0x3a3   : > { %3754 = vmatmul.mubr.msk.bf16.gmra.mrb[20].mxu1 %vm5080_vm14, %v5575_v49 }
 0x3a4   : > { %3757 = vmatprep.mubr.msk.bf16.mxu1 %vm5096_vm0, %v5576_v7 }
 0x3ab   : > { %3760 = vmatmul.mubr.msk.bf16.gmra.mrb[24].mxu1 %vm5096_vm0, %v5577_v55 }
 0x3ac   : > { %3763 = vmatprep.mubr.msk.bf16.mxu1 %vm5109_vm6, %v5578_v56 }
 0x3b3   : > { %3766 = vmatmul.mubr.msk.bf16.gmra.mrb[28].mxu1 %vm5109_vm6, %v5579_v40 }
 0x46e   : > { %v2887_v53 = vpop.f32.mrb[16].mxu1 }
 0x46f   : > { %v2954_v10 = vadd.f32 %v2947_v50, %v2887_v53  ;;  %v2889_v2 = vpop.f32.mrb[17].mxu1 }
 0x470   : > { %v2955_v33 = vadd.f32 %v2951_v25, %v2889_v2  ;;  %v2891_v59 = vpop.f32.mrb[18].mxu1  ;;  %v4359_v2 = vld [vmem:[#allocation2 + $0x10] sm:$0xff] }
 0x471   : > { %v2956_v36 = vadd.f32 %v2947_v50, %v2891_v59  ;;  %v2893_v34 = vpop.f32.mrb[19].mxu1  ;;  %v2970_v1 = vmax.f32 %v2954_v10, 0.0 }
 0x472   : > { %v2957_v47 = vadd.f32 %v2951_v25, %v2893_v34  ;;  %v2971_v23 = vmax.f32 %v2955_v33, 0.0  ;;  %v4360_v34 = vld [vmem:[#allocation2 + $0x18] sm:$0xff] }
 0x473   : > { %v2972_v35 = vmax.f32 %v2956_v36, 0.0 }
 0x474   : > { %v2973_v3 = vmax.f32 %v2957_v47, 0.0 }
 0x475   : > { %v2986_v9 = vpack.c.bf16 %v2972_v35, %v2970_v1  ;;  %v4362_v35 = vld [vmem:[#allocation2 + $0x28] sm:$0xff] }
 0x476   : > { %v2987_v21 = vpack.c.bf16 %v2973_v3, %v2971_v23  ;;  %v2897_v62 = vpop.f32.mrb[20].mxu1 }
 0x477   : > { %v2958_v5 = vadd.f32 %v2947_v50, %v2897_v62  ;;  %v2899_v26 = vpop.f32.mrb[21].mxu1 }
 0x478   : > { %v2959_v43 = vadd.f32 %v2951_v25, %v2899_v26  ;;  %v2901_v48 = vpop.f32.mrb[22].mxu1  ;;  %3230 = vmatprep.mubr.bf16.mxu0 %v2987_v21  ;;  %v4363_v26 = vld [vmem:[#allocation2 + $0x30] sm:$0xff] }
 0x479   : > { %v2960_v52 = vadd.f32 %v2947_v50, %v2901_v48  ;;  %v2903_v54 = vpop.f32.mrb[23].mxu1  ;;  %3231 = vmatmul.mubr.bf16.vlgmr.msra.gmra.mrb[16].mxu0 %v2986_v9  ;;  %v2974_v61 = vmax.f32 %v2958_v5, 0.0 }
 0x47a   : > { %v2961_v19 = vadd.f32 %v2951_v25, %v2903_v54  ;;  %v2975_v20 = vmax.f32 %v2959_v43, 0.0  ;;  %v4364_v54 = vld [vmem:[#allocation2 + $0x38] sm:$0xff] }
 0x47b   : > { %v2976_v42 = vmax.f32 %v2960_v52, 0.0 }
 0x47c   : > { %v2977_v24 = vmax.f32 %v2961_v19, 0.0 }
 0x47d   : > { %v2988_v31 = vpack.c.bf16 %v2976_v42, %v2974_v61  ;;  %v4365_v42 = vld [vmem:[#allocation2 + $0x40] sm:$0xff] }
 0x47e   : > { %v2989_v32 = vpack.c.bf16 %v2977_v24, %v2975_v20  ;;  %v2907_v18 = vpop.f32.mrb[24].mxu1  ;;  %v4366_v24 = vld [vmem:[#allocation2 + $0x48] sm:$0xff] }
 0x47f   : > { %v2962_v45 = vadd.f32 %v2947_v50, %v2907_v18  ;;  %v2909_v14 = vpop.f32.mrb[25].mxu1 }
 0x480   : > { %v2963_v17 = vadd.f32 %v2951_v25, %v2909_v14  ;;  %v2911_v28 = vpop.f32.mrb[26].mxu1  ;;  %3240 = vmatprep.mubr.bf16.mxu0 %v2989_v32 }
 0x481   : > { %v2964_v6 = vadd.f32 %v2947_v50, %v2911_v28  ;;  %v2913_v37 = vpop.f32.mrb[27].mxu1  ;;  %3241 = vmatmul.mubr.bf16.gmra.mrb[20].mxu0 %v2988_v31  ;;  %v2978_v41 = vmax.f32 %v2962_v45, 0.0  ;;  %v4367_v28 = vld [vmem:[#allocation2 + $0x50] sm:$0xff] }
 0x482   : > { %v2965_v58 = vadd.f32 %v2951_v25, %v2913_v37  ;;  %v2979_v51 = vmax.f32 %v2963_v17, 0.0 }
 0x483   : > { %v2980_v4 = vmax.f32 %v2964_v6, 0.0 }
 0x484   : > { %v2981_v60 = vmax.f32 %v2965_v58, 0.0 }
 0x485   : > { %v2990_v63 = vpack.c.bf16 %v2980_v4, %v2978_v41  ;;  %v4368_v41 = vld [vmem:[#allocation2 + $0x58] sm:$0xff] }
 0x486   : > { %v2991_v16 = vpack.c.bf16 %v2981_v60, %v2979_v51  ;;  %v2917_v57 = vpop.f32.mrb[28].mxu1  ;;  %v4369_v60 = vld [vmem:[#allocation2 + $0x60] sm:$0xff] }
 0x487   : > { %v2966_v12 = vadd.f32 %v2947_v50, %v2917_v57  ;;  %v2919_v8 = vpop.f32.mrb[29].mxu1 }
 0x488   : > { %v2967_v11 = vadd.f32 %v2951_v25, %v2919_v8  ;;  %v2921_v46 = vpop.f32.mrb[30].mxu1  ;;  %3250 = vmatprep.mubr.bf16.mxu0 %v2991_v16  ;;  %v4370_v16 = vld [vmem:[#allocation2 + $0x68] sm:$0xff] }
 0x489   : > { %v2968_v30 = vadd.f32 %v2947_v50, %v2921_v46  ;;  %v2923_v22 = vpop.f32.mrb[31].mxu1  ;;  %3251 = vmatmul.mubr.bf16.gmra.mrb[24].mxu0 %v2990_v63  ;;  %v2982_v49 = vmax.f32 %v2966_v12, 0.0 }
 0x48a   : > { %v2969_v27 = vadd.f32 %v2951_v25, %v2923_v22  ;;  %v2983_v55 = vmax.f32 %v2967_v11, 0.0  ;;  %v4371_v22 = vld [vmem:[#allocation2 + $0x70] sm:$0xff] }
 0x48b   : > { %v2984_v7 = vmax.f32 %v2968_v30, 0.0 }
 0x48c   : > { %v2985_v56 = vmax.f32 %v2969_v27, 0.0 }
 0x48d   : > { %v2992_v40 = vpack.c.bf16 %v2984_v7, %v2982_v49 }
 0x48e   : > { %v2993_v0 = vpack.c.bf16 %v2985_v56, %v2983_v55  ;;  %v4372_v55 = vld [vmem:[#allocation2 + $0x78] sm:$0xff] }
 0x490   : > { %3260 = vmatprep.mubr.bf16.mxu0 %v2993_v0  ;;  %v4373_v0 = vld [vmem:[#allocation2 + $0x80] sm:$0xff] }
 0x491   : > { %3261 = vmatmul.mubr.bf16.gmra.mrb[28].mxu0 %v2992_v40 }
 0x54c   : > { %v3232_v44 = vpop.f32.mrb[16].mxu0 }
 0x54d   : > { %v3233_v50 = vadd.f32 %v3232_v44, %v5426_v29  ;;  %v3234_v25 = vpop.f32.mrb[17].mxu0 }
 0x54e   : > { %v3235_v53 = vadd.f32 %v3234_v25, %v5429_v38  ;;  %v3236_v10 = vpop.f32.mrb[18].mxu0 }
 0x54f   : > { %v3271_v33 = vadd.f32 %v4359_v2, %v3233_v50  ;;  %v3237_v59 = vadd.f32 %v3236_v10, %v5426_v29  ;;  %v3238_v36 = vpop.f32.mrb[19].mxu0 }
 0x550   : > { %v3272_v47 = vadd.f32 %v4360_v34, %v3235_v53  ;;  %v3239_v13 = vadd.f32 %v3238_v36, %v5429_v38 }
 0x551   : > { %3287 = vst [vmem:[%s5437_s20] sm:$0xff] %v3271_v33  ;;  %v3273_v1 = vadd.f32 %v4361_v15, %v3237_v59 }
 0x552   : > { %3288 = vst [vmem:[%s5437_s20 + $0x8] sm:$0xff] %v3272_v47  ;;  %v3274_v23 = vadd.f32 %v4362_v35, %v3239_v13 }
 0x553   : > { %3289 = vst [vmem:[%s5437_s20 + $0x10] sm:$0xff] %v3273_v1 }
 0x554   : > { %3290 = vst [vmem:[%s5437_s20 + $0x18] sm:$0xff] %v3274_v23  ;;  %v3242_v3 = vpop.f32.mrb[20].mxu0 }
 0x555   : > { %v3243_v9 = vadd.f32 %v3242_v3, %v5426_v29  ;;  %v3244_v21 = vpop.f32.mrb[21].mxu0 }
 0x556   : > { %v3245_v62 = vadd.f32 %v3244_v21, %v5429_v38  ;;  %v3246_v5 = vpop.f32.mrb[22].mxu0 }
 0x557   : > { %v3275_v43 = vadd.f32 %v4363_v26, %v3243_v9  ;;  %v3247_v48 = vadd.f32 %v3246_v5, %v5426_v29  ;;  %v3248_v52 = vpop.f32.mrb[23].mxu0 }
 0x558   : > { %v3276_v19 = vadd.f32 %v4364_v54, %v3245_v62  ;;  %v3249_v61 = vadd.f32 %v3248_v52, %v5429_v38 }
 0x559   : > { %3291 = vst [vmem:[%s5437_s20 + $0x20] sm:$0xff] %v3275_v43  ;;  %v3277_v20 = vadd.f32 %v4365_v42, %v3247_v48 }
 0x55a   : > { %3292 = vst [vmem:[%s5437_s20 + $0x28] sm:$0xff] %v3276_v19  ;;  %v3278_v31 = vadd.f32 %v4366_v24, %v3249_v61 }
 0x55b   : > { %3293 = vst [vmem:[%s5437_s20 + $0x30] sm:$0xff] %v3277_v20 }
 0x55c   : > { %3294 = vst [vmem:[%s5437_s20 + $0x38] sm:$0xff] %v3278_v31  ;;  %v3252_v32 = vpop.f32.mrb[24].mxu0 }
 0x55d   : > { %v3253_v18 = vadd.f32 %v3252_v32, %v5426_v29  ;;  %v3254_v45 = vpop.f32.mrb[25].mxu0 }
 0x55e   : > { %v3255_v14 = vadd.f32 %v3254_v45, %v5429_v38  ;;  %v3256_v17 = vpop.f32.mrb[26].mxu0 }
 0x55f   : > { %v3279_v6 = vadd.f32 %v4367_v28, %v3253_v18  ;;  %v3257_v37 = vadd.f32 %v3256_v17, %v5426_v29  ;;  %v3258_v58 = vpop.f32.mrb[27].mxu0 }
 0x560   : > { %v3280_v4 = vadd.f32 %v4368_v41, %v3255_v14  ;;  %v3259_v51 = vadd.f32 %v3258_v58, %v5429_v38 }
 0x561   : > { %3295 = vst [vmem:[%s5437_s20 + $0x40] sm:$0xff] %v3279_v6  ;;  %v3281_v63 = vadd.f32 %v4369_v60, %v3257_v37 }
 0x562   : > { %3296 = vst [vmem:[%s5437_s20 + $0x48] sm:$0xff] %v3280_v4  ;;  %v3282_v57 = vadd.f32 %v4370_v16, %v3259_v51 }
 0x563   : > { %3297 = vst [vmem:[%s5437_s20 + $0x50] sm:$0xff] %v3281_v63 }
 0x564   : > { %3298 = vst [vmem:[%s5437_s20 + $0x58] sm:$0xff] %v3282_v57  ;;  %v3262_v12 = vpop.f32.mrb[28].mxu0 }
 0x565   : > { %v3263_v8 = vadd.f32 %v3262_v12, %v5426_v29  ;;  %v3264_v11 = vpop.f32.mrb[29].mxu0 }
 0x566   : > { %v3265_v46 = vadd.f32 %v3264_v11, %v5429_v38  ;;  %v3266_v30 = vpop.f32.mrb[30].mxu0 }
 0x567   : > { %v3283_v27 = vadd.f32 %v4371_v22, %v3263_v8  ;;  %v3267_v49 = vadd.f32 %v3266_v30, %v5426_v29  ;;  %v3268_v7 = vpop.f32.mrb[31].mxu0  ;;  %v4374_v29 = vld [vmem:[#allocation2 + $0x88] sm:$0xff] }
 0x568   : > { %v3284_v56 = vadd.f32 %v4372_v55, %v3265_v46  ;;  %v3269_v40 = vadd.f32 %v3268_v7, %v5429_v38 }
 0x569   : > { %3299 = vst [vmem:[%s5437_s20 + $0x60] sm:$0xff] %v3283_v27  ;;  %v3285_v39 = vadd.f32 %v4373_v0, %v3267_v49 }
 0x56a   : > { %3300 = vst [vmem:[%s5437_s20 + $0x68] sm:$0xff] %v3284_v56  ;;  %v3286_v44 = vadd.f32 %v4374_v29, %v3269_v40 }
 0x56b   : > { %3301 = vst [vmem:[%s5437_s20 + $0x70] sm:$0xff] %v3285_v39 }
 0x56c   : > { %3302 = vst [vmem:[%s5437_s20 + $0x78] sm:$0xff] %v3286_v44 }
 0x56d   : > { %4530 = shalt.err (!%p4527_p13)
}
 0x56e   : > { %s4531_s22 = scalar_lea.hbm %s5469_s29, 2048  ;;  %s4535_s20 = scalar_lea.hbm %s5580_s13, 4096 }
 0x56f   : > { %p4532_p9 = scmp.ne.s32.totalorder %s5469_s29, %s4531_s22  ;;  %p4536_p4 = scmp.lt.u32.totalorder %s5469_s29, %s5580_s13 }
 0x570   : > { %p4537_p8 = scmp.lt.u32.totalorder %s4535_s20, %s4531_s22  ;;  %p4539_p3 = scmp.lt.u32.totalorder %s4531_s22, %s5469_s29 }
 0x571   : > { %p4533_p0 = pnand %p4532_p9, %p4827_p10 }
 0x572   : > { %p4538_p6 = por %p4537_p8, %p4536_p4 }
 0x573   : > { %p4534_p11 = pneg %p4533_p0 }
 0x574   : > { %p4540_p5 = por %p4539_p3, %p4538_p6 }
 0x576   : > { %p4541_p7 = pnand %p4540_p5, %p4534_p11 }
 0x578   : > { %4544 = shalt.err (!%p4541_p7)
}
 0x579   : > { %s4604_s26 = smov 256   ;;  %s4605_s17 = smov 16  }
 0x57a   : > { %3891 = dma.vmem_to_hbm [thread:$0]  (%p4827_p10), %s5471_s30, 2048, %s5469_s29, %s3304_s15, %s4604_s26, %s4604_s26, %s4605_s17  }
 0x57b PF: > { %s5581_s21 = sld [smem:[#allocation18_spill]]  ;;  %s5582_s19 = sld [smem:[#allocation19_spill]] }
 0x57c   : > { %p5584_p1 = scmp.ge.s32.totalorder %s4591_s12, 2 }
 0x581   : > { %s3333_s24 = sand.u32 1, %s5581_s21   ;;  %p5583_p12 = scmp.ne.s32.totalorder %s5582_s19, 0 }
 0x582   : > { %s3334_s22 = scalar_lea.sflag [#allocation6], %s3333_s24 }
 0x583   : > { %p3911_p2 = pnand %p5584_p1, %p5583_p12 }
 0x585   : > { %4574 = dma.done.wait (!%p3911_p2), %s3334_s22, 2048  }
 0x586   : > { %4576 = vsyncadd (!%p3911_p2), %s3334_s22, 4294965248  ;;  %p24_p13 = scmp.ge.s32.totalorder %s4817_s14, 4   ;;  %s5585_s30 = smov %s4583_s10 }
 0x587   : > { %s5586_s10 = smov %s4587_s11  ;;  %s5587_s11 = smov %s4833_s28 }
 0x588   : > { %s5588_s12 = smov %s4817_s14  ;;  %26 = sbr.rel (!%p24_p13) target bundleno = 9 (0x9), region = 121 }
 0x58f   :  { %3339 = vsyncpa [#allocation5], 1 }
 0x590   :  { %3341 = vsyncpa [#allocation5 + $0x1], 1 }
 0x591   :  { %3342 = vsyncpa [#allocation8], 1 }
 0x592   :  { %3343 = vsyncpa [#allocation11], 1 }
 0x593   :  { %3344 = vsyncpa [#allocation6], 1 }
 0x594   :  { %3346 = vsyncpa [#allocation6 + $0x1], 1 }

</bundles_post_ra>
